<compile_context>
chip_gen: v6e
topology: v6e:2x2x1
jax: 0.10.0
libtpu: 0.0.40
codegen_flags: <defaults>
</compile_context>

<pallas_src>
import jax
import jax.numpy as jnp
import numpy as np
from jax.experimental import pallas as pl
from jax.experimental.pallas import tpu as pltpu


# --------------------------------------------------------------------------
# Fused kernel: (GraphConv + node-mean) -> GRU over T -> Linear
# one grid step = one batch element.
# --------------------------------------------------------------------------
def astgcn_fused_kernel(x_ref, abar_ref, gcn_w_ref, gcn_b_ref,
                        wir_ref, wiz_ref, win_ref,
                        whr_ref, whz_ref, whn_ref,
                        br_ref, bz_ref, bin_ref, bhn_ref,
                        wfc_ref, bfc_ref,
                        out_ref):
    # x_ref:    (1, T, N, C_aug)   augmented, time-major slice for this batch
    # abar_ref: (1, N, 1)          column-mean of adjacency A
    # gcn_w:    (C_aug, H)   gcn_b: (1, H)
    # GRU gate weights: (H, H) each; biases: (1, H) each
    # wfc: (H, O)  bfc: (1, O)     out_ref: (1, 1, O)
    xb = x_ref[0]                                 # (T, N, C_aug)
    abar = abar_ref[...]                          # (1, N, 1)

    # GraphConv + mean over nodes, using mean_n(A @ X) == abar @ X :
    #   red[t, c] = sum_n abar[n] * x[t, n, c]
    red = jnp.sum(xb * abar, axis=1)              # (T, C_aug)
    g = jnp.dot(red, gcn_w_ref[...],
                preferred_element_type=jnp.float32) + gcn_b_ref[...]   # (T, H)

    T = xb.shape[0]
    H = whr_ref.shape[0]

    wir = wir_ref[...]; wiz = wiz_ref[...]; win = win_ref[...]
    whr = whr_ref[...]; whz = whz_ref[...]; whn = whn_ref[...]
    br = br_ref[...]; bz = bz_ref[...]; bin_ = bin_ref[...]; bhn = bhn_ref[...]

    # GRU over time (T is a compile-time constant -> fully unrolled; hidden
    # state stays in vector registers).  PyTorch gate order (r, z, n).
    h = jnp.zeros((1, H), jnp.float32)
    for t in range(T):
        x_t = g[t:t + 1, :]                                             # (1, H)
        r = jax.nn.sigmoid(
            jnp.dot(x_t, wir, preferred_element_type=jnp.float32)
            + jnp.dot(h, whr, preferred_element_type=jnp.float32) + br)
        z = jax.nn.sigmoid(
            jnp.dot(x_t, wiz, preferred_element_type=jnp.float32)
            + jnp.dot(h, whz, preferred_element_type=jnp.float32) + bz)
        hn = jnp.dot(h, whn, preferred_element_type=jnp.float32) + bhn
        n = jnp.tanh(
            jnp.dot(x_t, win, preferred_element_type=jnp.float32) + bin_ + r * hn)
        h = (1.0 - z) * n + z * h

    # Final Linear on the last hidden state.
    y = jnp.dot(h, wfc_ref[...], preferred_element_type=jnp.float32) + bfc_ref[...]
    out_ref[0, :, :] = y                                                # (1, O)


# --------------------------------------------------------------------------
# Full ASTGCN forward (tiny glue in plain JAX, all compute in one Pallas call).
# --------------------------------------------------------------------------
def astgcn_forward(params, x, static=None, dynamic=None):
    B, C, N, T = x.shape

    # AttributeAugment + permute (8 KB at these shapes; left to XLA).
    feats = [x]
    if static is not None:
        P = static.shape[1]
        feats.append(jnp.broadcast_to(static[..., None], (B, P, N, T)))
    if dynamic is not None:
        feats.append(dynamic)
    x_aug = jnp.concatenate(feats, axis=1)             # (B, C_aug, N, T)
    x_perm = jnp.transpose(x_aug, (0, 3, 2, 1))        # (B, T, N, C_aug)
    C_aug = x_perm.shape[-1]

    # mean_n A[n, m]  ->  the node-mean commutes with the (assumed) GraphConv.
    abar = jnp.mean(params["A"], axis=0).reshape(1, N, 1)

    H = params["w_hh"].shape[0]
    O = params["fc_w"].shape[1]

    # Split GRU weights per gate (PyTorch order r, z, n) -> lane-aligned dots;
    # pre-merge the r/z biases (the n-gate biases cannot be merged due to r*gh_n).
    w_ih, w_hh = params["w_ih"], params["w_hh"]
    b_ih, b_hh = params["b_ih"], params["b_hh"]
    wir, wiz, win = w_ih[:, :H], w_ih[:, H:2 * H], w_ih[:, 2 * H:]
    whr, whz, whn = w_hh[:, :H], w_hh[:, H:2 * H], w_hh[:, 2 * H:]
    br = b_ih[:, :H] + b_hh[:, :H]
    bz = b_ih[:, H:2 * H] + b_hh[:, H:2 * H]
    bin_ = b_ih[:, 2 * H:]
    bhn = b_hh[:, 2 * H:]

    out = pl.pallas_call(
        astgcn_fused_kernel,
        out_shape=jax.ShapeDtypeStruct((B, 1, O), jnp.float32),
        grid=(B,),
        in_specs=[
            pl.BlockSpec((1, T, N, C_aug), lambda b: (b, 0, 0, 0)),   # x_perm
            pl.BlockSpec((1, N, 1), lambda b: (0, 0, 0)),             # abar
            pl.BlockSpec((C_aug, H), lambda b: (0, 0)),               # gcn_w
            pl.BlockSpec((1, H), lambda b: (0, 0)),                   # gcn_b
            pl.BlockSpec((H, H), lambda b: (0, 0)),                   # wir
            pl.BlockSpec((H, H), lambda b: (0, 0)),                   # wiz
            pl.BlockSpec((H, H), lambda b: (0, 0)),                   # win
            pl.BlockSpec((H, H), lambda b: (0, 0)),                   # whr
            pl.BlockSpec((H, H), lambda b: (0, 0)),                   # whz
            pl.BlockSpec((H, H), lambda b: (0, 0)),                   # whn
            pl.BlockSpec((1, H), lambda b: (0, 0)),                   # br
            pl.BlockSpec((1, H), lambda b: (0, 0)),                   # bz
            pl.BlockSpec((1, H), lambda b: (0, 0)),                   # bin
            pl.BlockSpec((1, H), lambda b: (0, 0)),                   # bhn
            pl.BlockSpec((H, O), lambda b: (0, 0)),                   # fc_w
            pl.BlockSpec((1, O), lambda b: (0, 0)),                   # fc_b
        ],
        out_specs=pl.BlockSpec((1, 1, O), lambda b: (b, 0, 0)),
        compiler_params=pltpu.CompilerParams(dimension_semantics=("parallel",)),
    )(x_perm, abar, params["gcn_w"], params["gcn_b"],
      wir, wiz, win, whr, whz, whn, br, bz, bin_, bhn,
      params["fc_w"], params["fc_b"])

    return out[:, 0, :].reshape(B, -1, N, 1)


# --------------------------------------------------------------------------
# Pure-JAX reference (mirrors the PyTorch forward, full A, fused gate matrices)
# --------------------------------------------------------------------------
def reference_forward(params, x, static=None, dynamic=None):
    B, C, N, T = x.shape
    feats = [x]
    if static is not None:
        P = static.shape[1]
        feats.append(jnp.broadcast_to(static[..., None], (B, P, N, T)))
    if dynamic is not None:
        feats.append(dynamic)
    x_aug = jnp.concatenate(feats, axis=1)
    xp = jnp.transpose(x_aug, (0, 3, 2, 1))            # [B, T, N, C_aug]
    g = jnp.einsum("nm,btmc->btnc", params["A"], xp)
    g = jnp.einsum("btnc,ch->btnh", g, params["gcn_w"]) + params["gcn_b"]
    g = g.mean(axis=2)                                 # [B, T, H]
    H = params["w_hh"].shape[0]
    h = jnp.zeros((B, H), jnp.float32)
    for t in range(T):
        x_t = g[:, t, :]
        gi = x_t @ params["w_ih"] + params["b_ih"]
        gh = h @ params["w_hh"] + params["b_hh"]
        r = jax.nn.sigmoid(gi[:, :H] + gh[:, :H])
        z = jax.nn.sigmoid(gi[:, H:2 * H] + gh[:, H:2 * H])
        n = jnp.tanh(gi[:, 2 * H:] + r * gh[:, 2 * H:])
        h = (1.0 - z) * n + z * h
    y = h @ params["fc_w"] + params["fc_b"]
    return y.reshape(B, -1, N, 1)


if __name__ == "__main__":
    B, C, N, T = 2, 4, 16, 8          # batch, raw channels, nodes, time
    P, Wdyn = 2, 2                    # static / dynamic attribute channels
    hid, out_channels = 32, 2
    C_aug = C + P + Wdyn              # in_channels seen by the cell

    key = jax.random.PRNGKey(0)
    ks = jax.random.split(key, 12)
    x = jax.random.normal(ks[0], (B, C, N, T), jnp.float32)
    static = jax.random.normal(ks[1], (B, P, N), jnp.float32)
    dynamic = jax.random.normal(ks[2], (B, Wdyn, N, T), jnp.float32)

    A_raw = jax.random.uniform(ks[3], (N, N), jnp.float32) + jnp.eye(N, dtype=jnp.float32)
    A = A_raw / jnp.sum(A_raw, axis=1, keepdims=True)      # row-normalized adjacency

    params = {
        "A": A,
        # GraphConv:  g = A @ x @ gcn_w + gcn_b
        "gcn_w": 0.1 * jax.random.normal(ks[4], (C_aug, hid), jnp.float32),
        "gcn_b": 0.1 * jax.random.normal(ks[5], (1, hid), jnp.float32),
        # GRU (PyTorch gate order r, z, n); stored transposed: x @ w_ih, h @ w_hh
        "w_ih": 0.1 * jax.random.normal(ks[6], (hid, 3 * hid), jnp.float32),
        "w_hh": 0.1 * jax.random.normal(ks[7], (hid, 3 * hid), jnp.float32),
        "b_ih": 0.1 * jax.random.normal(ks[8], (1, 3 * hid), jnp.float32),
        "b_hh": 0.1 * jax.random.normal(ks[9], (1, 3 * hid), jnp.float32),
        # fc: Linear(hid, out_channels * N), stored transposed
        "fc_w": 0.1 * jax.random.normal(ks[10], (hid, out_channels * N), jnp.float32),
        "fc_b": 0.1 * jax.random.normal(ks[11], (1, out_channels * N), jnp.float32),
    }

    y = jax.block_until_ready(astgcn_forward(params, x, static, dynamic))
    y_ref = jax.block_until_ready(reference_forward(params, x, static, dynamic))

    assert y.shape == (B, out_channels, N, 1), y.shape
    np.testing.assert_allclose(np.asarray(y), np.asarray(y_ref), rtol=1e-3, atol=1e-3)
    print("KERNEL_OK")
</pallas_src>

<mosaic_0001>
module attributes {stable_mosaic.version = 11 : i64} {
  func.func @astgcn_fused_kernel(%arg0: i32, %arg1: memref<1x8x16x8xf32, #tpu.memory_space<vmem>>, %arg2: memref<1x16x1xf32, #tpu.memory_space<vmem>>, %arg3: memref<8x32xf32, #tpu.memory_space<vmem>>, %arg4: memref<1x32xf32, #tpu.memory_space<vmem>>, %arg5: memref<32x32xf32, #tpu.memory_space<vmem>>, %arg6: memref<32x32xf32, #tpu.memory_space<vmem>>, %arg7: memref<32x32xf32, #tpu.memory_space<vmem>>, %arg8: memref<32x32xf32, #tpu.memory_space<vmem>>, %arg9: memref<32x32xf32, #tpu.memory_space<vmem>>, %arg10: memref<32x32xf32, #tpu.memory_space<vmem>>, %arg11: memref<1x32xf32, #tpu.memory_space<vmem>>, %arg12: memref<1x32xf32, #tpu.memory_space<vmem>>, %arg13: memref<1x32xf32, #tpu.memory_space<vmem>>, %arg14: memref<1x32xf32, #tpu.memory_space<vmem>>, %arg15: memref<32x32xf32, #tpu.memory_space<vmem>>, %arg16: memref<1x32xf32, #tpu.memory_space<vmem>>, %arg17: memref<1x1x32xf32, #tpu.memory_space<vmem>>) attributes {dimension_semantics = [#tpu.dimension_semantics<parallel>], iteration_bounds = array<i64: 2>, scalar_prefetch = 0 : i64, scratch_operands = 0 : i64, tpu.core_type = #tpu.core_type<tc>, window_params = [{transform_indices = @transform_0, window_bounds = array<i64: 1, 8, 16, 8>}, {pipeline_mode = #tpu.pipeline_mode<synchronous>, transform_indices = @transform_1, window_bounds = array<i64: 1, 16, 1>}, {pipeline_mode = #tpu.pipeline_mode<synchronous>, transform_indices = @transform_2, window_bounds = array<i64: 8, 32>}, {pipeline_mode = #tpu.pipeline_mode<synchronous>, transform_indices = @transform_3, window_bounds = array<i64: 1, 32>}, {pipeline_mode = #tpu.pipeline_mode<synchronous>, transform_indices = @transform_4, window_bounds = array<i64: 32, 32>}, {pipeline_mode = #tpu.pipeline_mode<synchronous>, transform_indices = @transform_5, window_bounds = array<i64: 32, 32>}, {pipeline_mode = #tpu.pipeline_mode<synchronous>, transform_indices = @transform_6, window_bounds = array<i64: 32, 32>}, {pipeline_mode = #tpu.pipeline_mode<synchronous>, transform_indices = @transform_7, window_bounds = array<i64: 32, 32>}, {pipeline_mode = #tpu.pipeline_mode<synchronous>, transform_indices = @transform_8, window_bounds = array<i64: 32, 32>}, {pipeline_mode = #tpu.pipeline_mode<synchronous>, transform_indices = @transform_9, window_bounds = array<i64: 32, 32>}, {pipeline_mode = #tpu.pipeline_mode<synchronous>, transform_indices = @transform_10, window_bounds = array<i64: 1, 32>}, {pipeline_mode = #tpu.pipeline_mode<synchronous>, transform_indices = @transform_11, window_bounds = array<i64: 1, 32>}, {pipeline_mode = #tpu.pipeline_mode<synchronous>, transform_indices = @transform_12, window_bounds = array<i64: 1, 32>}, {pipeline_mode = #tpu.pipeline_mode<synchronous>, transform_indices = @transform_13, window_bounds = array<i64: 1, 32>}, {pipeline_mode = #tpu.pipeline_mode<synchronous>, transform_indices = @transform_14, window_bounds = array<i64: 32, 32>}, {pipeline_mode = #tpu.pipeline_mode<synchronous>, transform_indices = @transform_15, window_bounds = array<i64: 1, 32>}, {transform_indices = @transform_16, window_bounds = array<i64: 1, 1, 32>}]} {
    %c0 = arith.constant 0 : index
    %c0_0 = arith.constant 0 : index
    %c0_1 = arith.constant 0 : index
    %c0_2 = arith.constant 0 : index
    %0 = vector.load %arg1[%c0, %c0_0, %c0_1, %c0_2] : memref<1x8x16x8xf32, #tpu.memory_space<vmem>>, vector<1x8x16x8xf32>
    %1 = vector.shape_cast %0 : vector<1x8x16x8xf32> to vector<8x16x8xf32>
    %c0_3 = arith.constant 0 : index
    %c0_4 = arith.constant 0 : index
    %c0_5 = arith.constant 0 : index
    %2 = vector.load %arg2[%c0_3, %c0_4, %c0_5] : memref<1x16x1xf32, #tpu.memory_space<vmem>>, vector<1x16x1xf32>
    %3 = vector.broadcast %2 : vector<1x16x1xf32> to vector<8x16x8xf32>
    %4 = arith.mulf %1, %3 : vector<8x16x8xf32>
    %cst = arith.constant dense<0.000000e+00> : vector<8x8xf32>
    %5 = vector.multi_reduction <add>, %4, %cst [1] : vector<8x16x8xf32> to vector<8x8xf32>
    %c0_6 = arith.constant 0 : index
    %c0_7 = arith.constant 0 : index
    %6 = vector.load %arg3[%c0_6, %c0_7] : memref<8x32xf32, #tpu.memory_space<vmem>>, vector<8x32xf32>
    %cst_8 = arith.constant dense<0.000000e+00> : vector<8x32xf32>
    %7 = tpu.matmul %5, %6, %cst_8 {dimension_numbers = #tpu.dot_dimension_numbers<[1], [0], [0], [1], [0, 0, 1, 1], [], []>} : vector<8x8xf32>, vector<8x32xf32>, vector<8x32xf32> -> vector<8x32xf32>
    %c0_9 = arith.constant 0 : index
    %c0_10 = arith.constant 0 : index
    %8 = vector.load %arg4[%c0_9, %c0_10] : memref<1x32xf32, #tpu.memory_space<vmem>>, vector<1x32xf32>
    %9 = vector.broadcast %8 : vector<1x32xf32> to vector<8x32xf32>
    %10 = arith.addf %7, %9 : vector<8x32xf32>
    %c0_11 = arith.constant 0 : index
    %c0_12 = arith.constant 0 : index
    %11 = vector.load %arg5[%c0_11, %c0_12] : memref<32x32xf32, #tpu.memory_space<vmem>>, vector<32x32xf32>
    %c0_13 = arith.constant 0 : index
    %c0_14 = arith.constant 0 : index
    %12 = vector.load %arg6[%c0_13, %c0_14] : memref<32x32xf32, #tpu.memory_space<vmem>>, vector<32x32xf32>
    %c0_15 = arith.constant 0 : index
    %c0_16 = arith.constant 0 : index
    %13 = vector.load %arg7[%c0_15, %c0_16] : memref<32x32xf32, #tpu.memory_space<vmem>>, vector<32x32xf32>
    %c0_17 = arith.constant 0 : index
    %c0_18 = arith.constant 0 : index
    %14 = vector.load %arg8[%c0_17, %c0_18] : memref<32x32xf32, #tpu.memory_space<vmem>>, vector<32x32xf32>
    %c0_19 = arith.constant 0 : index
    %c0_20 = arith.constant 0 : index
    %15 = vector.load %arg9[%c0_19, %c0_20] : memref<32x32xf32, #tpu.memory_space<vmem>>, vector<32x32xf32>
    %c0_21 = arith.constant 0 : index
    %c0_22 = arith.constant 0 : index
    %16 = vector.load %arg10[%c0_21, %c0_22] : memref<32x32xf32, #tpu.memory_space<vmem>>, vector<32x32xf32>
    %c0_23 = arith.constant 0 : index
    %c0_24 = arith.constant 0 : index
    %17 = vector.load %arg11[%c0_23, %c0_24] : memref<1x32xf32, #tpu.memory_space<vmem>>, vector<1x32xf32>
    %c0_25 = arith.constant 0 : index
    %c0_26 = arith.constant 0 : index
    %18 = vector.load %arg12[%c0_25, %c0_26] : memref<1x32xf32, #tpu.memory_space<vmem>>, vector<1x32xf32>
    %c0_27 = arith.constant 0 : index
    %c0_28 = arith.constant 0 : index
    %19 = vector.load %arg13[%c0_27, %c0_28] : memref<1x32xf32, #tpu.memory_space<vmem>>, vector<1x32xf32>
    %c0_29 = arith.constant 0 : index
    %c0_30 = arith.constant 0 : index
    %20 = vector.load %arg14[%c0_29, %c0_30] : memref<1x32xf32, #tpu.memory_space<vmem>>, vector<1x32xf32>
    %cst_31 = arith.constant 0.000000e+00 : f32
    %21 = vector.broadcast %cst_31 : f32 to vector<1x32xf32>
    %22 = vector.extract_strided_slice %10 {offsets = [0, 0], sizes = [1, 32], strides = [1, 1]} : vector<8x32xf32> to vector<1x32xf32>
    %cst_32 = arith.constant dense<0.000000e+00> : vector<1x32xf32>
    %23 = tpu.matmul %22, %11, %cst_32 {dimension_numbers = #tpu.dot_dimension_numbers<[1], [0], [0], [1], [0, 0, 1, 1], [], []>} : vector<1x32xf32>, vector<32x32xf32>, vector<1x32xf32> -> vector<1x32xf32>
    %cst_33 = arith.constant dense<0.000000e+00> : vector<1x32xf32>
    %24 = tpu.matmul %21, %14, %cst_33 {dimension_numbers = #tpu.dot_dimension_numbers<[1], [0], [0], [1], [0, 0, 1, 1], [], []>} : vector<1x32xf32>, vector<32x32xf32>, vector<1x32xf32> -> vector<1x32xf32>
    %25 = arith.addf %23, %24 : vector<1x32xf32>
    %26 = arith.addf %25, %17 : vector<1x32xf32>
    %27 = arith.negf %26 : vector<1x32xf32>
    %28 = math.exp %27 : vector<1x32xf32>
    %cst_34 = arith.constant 1.000000e+00 : f32
    %29 = vector.broadcast %cst_34 : f32 to vector<1x32xf32>
    %30 = arith.addf %29, %28 : vector<1x32xf32>
    %31 = arith.divf %29, %30 : vector<1x32xf32>
    %cst_35 = arith.constant dense<0.000000e+00> : vector<1x32xf32>
    %32 = tpu.matmul %22, %12, %cst_35 {dimension_numbers = #tpu.dot_dimension_numbers<[1], [0], [0], [1], [0, 0, 1, 1], [], []>} : vector<1x32xf32>, vector<32x32xf32>, vector<1x32xf32> -> vector<1x32xf32>
    %cst_36 = arith.constant dense<0.000000e+00> : vector<1x32xf32>
    %33 = tpu.matmul %21, %15, %cst_36 {dimension_numbers = #tpu.dot_dimension_numbers<[1], [0], [0], [1], [0, 0, 1, 1], [], []>} : vector<1x32xf32>, vector<32x32xf32>, vector<1x32xf32> -> vector<1x32xf32>
    %34 = arith.addf %32, %33 : vector<1x32xf32>
    %35 = arith.addf %34, %18 : vector<1x32xf32>
    %36 = arith.negf %35 : vector<1x32xf32>
    %37 = math.exp %36 : vector<1x32xf32>
    %cst_37 = arith.constant 1.000000e+00 : f32
    %38 = vector.broadcast %cst_37 : f32 to vector<1x32xf32>
    %39 = arith.addf %38, %37 : vector<1x32xf32>
    %40 = arith.divf %38, %39 : vector<1x32xf32>
    %cst_38 = arith.constant dense<0.000000e+00> : vector<1x32xf32>
    %41 = tpu.matmul %21, %16, %cst_38 {dimension_numbers = #tpu.dot_dimension_numbers<[1], [0], [0], [1], [0, 0, 1, 1], [], []>} : vector<1x32xf32>, vector<32x32xf32>, vector<1x32xf32> -> vector<1x32xf32>
    %42 = arith.addf %41, %20 : vector<1x32xf32>
    %cst_39 = arith.constant dense<0.000000e+00> : vector<1x32xf32>
    %43 = tpu.matmul %22, %13, %cst_39 {dimension_numbers = #tpu.dot_dimension_numbers<[1], [0], [0], [1], [0, 0, 1, 1], [], []>} : vector<1x32xf32>, vector<32x32xf32>, vector<1x32xf32> -> vector<1x32xf32>
    %44 = arith.addf %43, %19 : vector<1x32xf32>
    %45 = arith.mulf %31, %42 : vector<1x32xf32>
    %46 = arith.addf %44, %45 : vector<1x32xf32>
    %47 = math.tanh %46 : vector<1x32xf32>
    %cst_40 = arith.constant 1.000000e+00 : f32
    %48 = vector.broadcast %cst_40 : f32 to vector<1x32xf32>
    %49 = arith.subf %48, %40 : vector<1x32xf32>
    %50 = arith.mulf %49, %47 : vector<1x32xf32>
    %51 = arith.mulf %40, %21 : vector<1x32xf32>
    %52 = arith.addf %50, %51 : vector<1x32xf32>
    %53 = vector.extract_strided_slice %10 {offsets = [1, 0], sizes = [1, 32], strides = [1, 1]} : vector<8x32xf32> to vector<1x32xf32>
    %cst_41 = arith.constant dense<0.000000e+00> : vector<1x32xf32>
    %54 = tpu.matmul %53, %11, %cst_41 {dimension_numbers = #tpu.dot_dimension_numbers<[1], [0], [0], [1], [0, 0, 1, 1], [], []>} : vector<1x32xf32>, vector<32x32xf32>, vector<1x32xf32> -> vector<1x32xf32>
    %cst_42 = arith.constant dense<0.000000e+00> : vector<1x32xf32>
    %55 = tpu.matmul %52, %14, %cst_42 {dimension_numbers = #tpu.dot_dimension_numbers<[1], [0], [0], [1], [0, 0, 1, 1], [], []>} : vector<1x32xf32>, vector<32x32xf32>, vector<1x32xf32> -> vector<1x32xf32>
    %56 = arith.addf %54, %55 : vector<1x32xf32>
    %57 = arith.addf %56, %17 : vector<1x32xf32>
    %58 = arith.negf %57 : vector<1x32xf32>
    %59 = math.exp %58 : vector<1x32xf32>
    %cst_43 = arith.constant 1.000000e+00 : f32
    %60 = vector.broadcast %cst_43 : f32 to vector<1x32xf32>
    %61 = arith.addf %60, %59 : vector<1x32xf32>
    %62 = arith.divf %60, %61 : vector<1x32xf32>
    %cst_44 = arith.constant dense<0.000000e+00> : vector<1x32xf32>
    %63 = tpu.matmul %53, %12, %cst_44 {dimension_numbers = #tpu.dot_dimension_numbers<[1], [0], [0], [1], [0, 0, 1, 1], [], []>} : vector<1x32xf32>, vector<32x32xf32>, vector<1x32xf32> -> vector<1x32xf32>
    %cst_45 = arith.constant dense<0.000000e+00> : vector<1x32xf32>
    %64 = tpu.matmul %52, %15, %cst_45 {dimension_numbers = #tpu.dot_dimension_numbers<[1], [0], [0], [1], [0, 0, 1, 1], [], []>} : vector<1x32xf32>, vector<32x32xf32>, vector<1x32xf32> -> vector<1x32xf32>
    %65 = arith.addf %63, %64 : vector<1x32xf32>
    %66 = arith.addf %65, %18 : vector<1x32xf32>
    %67 = arith.negf %66 : vector<1x32xf32>
    %68 = math.exp %67 : vector<1x32xf32>
    %cst_46 = arith.constant 1.000000e+00 : f32
    %69 = vector.broadcast %cst_46 : f32 to vector<1x32xf32>
    %70 = arith.addf %69, %68 : vector<1x32xf32>
    %71 = arith.divf %69, %70 : vector<1x32xf32>
    %cst_47 = arith.constant dense<0.000000e+00> : vector<1x32xf32>
    %72 = tpu.matmul %52, %16, %cst_47 {dimension_numbers = #tpu.dot_dimension_numbers<[1], [0], [0], [1], [0, 0, 1, 1], [], []>} : vector<1x32xf32>, vector<32x32xf32>, vector<1x32xf32> -> vector<1x32xf32>
    %73 = arith.addf %72, %20 : vector<1x32xf32>
    %cst_48 = arith.constant dense<0.000000e+00> : vector<1x32xf32>
    %74 = tpu.matmul %53, %13, %cst_48 {dimension_numbers = #tpu.dot_dimension_numbers<[1], [0], [0], [1], [0, 0, 1, 1], [], []>} : vector<1x32xf32>, vector<32x32xf32>, vector<1x32xf32> -> vector<1x32xf32>
    %75 = arith.addf %74, %19 : vector<1x32xf32>
    %76 = arith.mulf %62, %73 : vector<1x32xf32>
    %77 = arith.addf %75, %76 : vector<1x32xf32>
    %78 = math.tanh %77 : vector<1x32xf32>
    %cst_49 = arith.constant 1.000000e+00 : f32
    %79 = vector.broadcast %cst_49 : f32 to vector<1x32xf32>
    %80 = arith.subf %79, %71 : vector<1x32xf32>
    %81 = arith.mulf %80, %78 : vector<1x32xf32>
    %82 = arith.mulf %71, %52 : vector<1x32xf32>
    %83 = arith.addf %81, %82 : vector<1x32xf32>
    %84 = vector.extract_strided_slice %10 {offsets = [2, 0], sizes = [1, 32], strides = [1, 1]} : vector<8x32xf32> to vector<1x32xf32>
    %cst_50 = arith.constant dense<0.000000e+00> : vector<1x32xf32>
    %85 = tpu.matmul %84, %11, %cst_50 {dimension_numbers = #tpu.dot_dimension_numbers<[1], [0], [0], [1], [0, 0, 1, 1], [], []>} : vector<1x32xf32>, vector<32x32xf32>, vector<1x32xf32> -> vector<1x32xf32>
    %cst_51 = arith.constant dense<0.000000e+00> : vector<1x32xf32>
    %86 = tpu.matmul %83, %14, %cst_51 {dimension_numbers = #tpu.dot_dimension_numbers<[1], [0], [0], [1], [0, 0, 1, 1], [], []>} : vector<1x32xf32>, vector<32x32xf32>, vector<1x32xf32> -> vector<1x32xf32>
    %87 = arith.addf %85, %86 : vector<1x32xf32>
    %88 = arith.addf %87, %17 : vector<1x32xf32>
    %89 = arith.negf %88 : vector<1x32xf32>
    %90 = math.exp %89 : vector<1x32xf32>
    %cst_52 = arith.constant 1.000000e+00 : f32
    %91 = vector.broadcast %cst_52 : f32 to vector<1x32xf32>
    %92 = arith.addf %91, %90 : vector<1x32xf32>
    %93 = arith.divf %91, %92 : vector<1x32xf32>
    %cst_53 = arith.constant dense<0.000000e+00> : vector<1x32xf32>
    %94 = tpu.matmul %84, %12, %cst_53 {dimension_numbers = #tpu.dot_dimension_numbers<[1], [0], [0], [1], [0, 0, 1, 1], [], []>} : vector<1x32xf32>, vector<32x32xf32>, vector<1x32xf32> -> vector<1x32xf32>
    %cst_54 = arith.constant dense<0.000000e+00> : vector<1x32xf32>
    %95 = tpu.matmul %83, %15, %cst_54 {dimension_numbers = #tpu.dot_dimension_numbers<[1], [0], [0], [1], [0, 0, 1, 1], [], []>} : vector<1x32xf32>, vector<32x32xf32>, vector<1x32xf32> -> vector<1x32xf32>
    %96 = arith.addf %94, %95 : vector<1x32xf32>
    %97 = arith.addf %96, %18 : vector<1x32xf32>
    %98 = arith.negf %97 : vector<1x32xf32>
    %99 = math.exp %98 : vector<1x32xf32>
    %cst_55 = arith.constant 1.000000e+00 : f32
    %100 = vector.broadcast %cst_55 : f32 to vector<1x32xf32>
    %101 = arith.addf %100, %99 : vector<1x32xf32>
    %102 = arith.divf %100, %101 : vector<1x32xf32>
    %cst_56 = arith.constant dense<0.000000e+00> : vector<1x32xf32>
    %103 = tpu.matmul %83, %16, %cst_56 {dimension_numbers = #tpu.dot_dimension_numbers<[1], [0], [0], [1], [0, 0, 1, 1], [], []>} : vector<1x32xf32>, vector<32x32xf32>, vector<1x32xf32> -> vector<1x32xf32>
    %104 = arith.addf %103, %20 : vector<1x32xf32>
    %cst_57 = arith.constant dense<0.000000e+00> : vector<1x32xf32>
    %105 = tpu.matmul %84, %13, %cst_57 {dimension_numbers = #tpu.dot_dimension_numbers<[1], [0], [0], [1], [0, 0, 1, 1], [], []>} : vector<1x32xf32>, vector<32x32xf32>, vector<1x32xf32> -> vector<1x32xf32>
    %106 = arith.addf %105, %19 : vector<1x32xf32>
    %107 = arith.mulf %93, %104 : vector<1x32xf32>
    %108 = arith.addf %106, %107 : vector<1x32xf32>
    %109 = math.tanh %108 : vector<1x32xf32>
    %cst_58 = arith.constant 1.000000e+00 : f32
    %110 = vector.broadcast %cst_58 : f32 to vector<1x32xf32>
    %111 = arith.subf %110, %102 : vector<1x32xf32>
    %112 = arith.mulf %111, %109 : vector<1x32xf32>
    %113 = arith.mulf %102, %83 : vector<1x32xf32>
    %114 = arith.addf %112, %113 : vector<1x32xf32>
    %115 = vector.extract_strided_slice %10 {offsets = [3, 0], sizes = [1, 32], strides = [1, 1]} : vector<8x32xf32> to vector<1x32xf32>
    %cst_59 = arith.constant dense<0.000000e+00> : vector<1x32xf32>
    %116 = tpu.matmul %115, %11, %cst_59 {dimension_numbers = #tpu.dot_dimension_numbers<[1], [0], [0], [1], [0, 0, 1, 1], [], []>} : vector<1x32xf32>, vector<32x32xf32>, vector<1x32xf32> -> vector<1x32xf32>
    %cst_60 = arith.constant dense<0.000000e+00> : vector<1x32xf32>
    %117 = tpu.matmul %114, %14, %cst_60 {dimension_numbers = #tpu.dot_dimension_numbers<[1], [0], [0], [1], [0, 0, 1, 1], [], []>} : vector<1x32xf32>, vector<32x32xf32>, vector<1x32xf32> -> vector<1x32xf32>
    %118 = arith.addf %116, %117 : vector<1x32xf32>
    %119 = arith.addf %118, %17 : vector<1x32xf32>
    %120 = arith.negf %119 : vector<1x32xf32>
    %121 = math.exp %120 : vector<1x32xf32>
    %cst_61 = arith.constant 1.000000e+00 : f32
    %122 = vector.broadcast %cst_61 : f32 to vector<1x32xf32>
    %123 = arith.addf %122, %121 : vector<1x32xf32>
    %124 = arith.divf %122, %123 : vector<1x32xf32>
    %cst_62 = arith.constant dense<0.000000e+00> : vector<1x32xf32>
    %125 = tpu.matmul %115, %12, %cst_62 {dimension_numbers = #tpu.dot_dimension_numbers<[1], [0], [0], [1], [0, 0, 1, 1], [], []>} : vector<1x32xf32>, vector<32x32xf32>, vector<1x32xf32> -> vector<1x32xf32>
    %cst_63 = arith.constant dense<0.000000e+00> : vector<1x32xf32>
    %126 = tpu.matmul %114, %15, %cst_63 {dimension_numbers = #tpu.dot_dimension_numbers<[1], [0], [0], [1], [0, 0, 1, 1], [], []>} : vector<1x32xf32>, vector<32x32xf32>, vector<1x32xf32> -> vector<1x32xf32>
    %127 = arith.addf %125, %126 : vector<1x32xf32>
    %128 = arith.addf %127, %18 : vector<1x32xf32>
    %129 = arith.negf %128 : vector<1x32xf32>
    %130 = math.exp %129 : vector<1x32xf32>
    %cst_64 = arith.constant 1.000000e+00 : f32
    %131 = vector.broadcast %cst_64 : f32 to vector<1x32xf32>
    %132 = arith.addf %131, %130 : vector<1x32xf32>
    %133 = arith.divf %131, %132 : vector<1x32xf32>
    %cst_65 = arith.constant dense<0.000000e+00> : vector<1x32xf32>
    %134 = tpu.matmul %114, %16, %cst_65 {dimension_numbers = #tpu.dot_dimension_numbers<[1], [0], [0], [1], [0, 0, 1, 1], [], []>} : vector<1x32xf32>, vector<32x32xf32>, vector<1x32xf32> -> vector<1x32xf32>
    %135 = arith.addf %134, %20 : vector<1x32xf32>
    %cst_66 = arith.constant dense<0.000000e+00> : vector<1x32xf32>
    %136 = tpu.matmul %115, %13, %cst_66 {dimension_numbers = #tpu.dot_dimension_numbers<[1], [0], [0], [1], [0, 0, 1, 1], [], []>} : vector<1x32xf32>, vector<32x32xf32>, vector<1x32xf32> -> vector<1x32xf32>
    %137 = arith.addf %136, %19 : vector<1x32xf32>
    %138 = arith.mulf %124, %135 : vector<1x32xf32>
    %139 = arith.addf %137, %138 : vector<1x32xf32>
    %140 = math.tanh %139 : vector<1x32xf32>
    %cst_67 = arith.constant 1.000000e+00 : f32
    %141 = vector.broadcast %cst_67 : f32 to vector<1x32xf32>
    %142 = arith.subf %141, %133 : vector<1x32xf32>
    %143 = arith.mulf %142, %140 : vector<1x32xf32>
    %144 = arith.mulf %133, %114 : vector<1x32xf32>
    %145 = arith.addf %143, %144 : vector<1x32xf32>
    %146 = vector.extract_strided_slice %10 {offsets = [4, 0], sizes = [1, 32], strides = [1, 1]} : vector<8x32xf32> to vector<1x32xf32>
    %cst_68 = arith.constant dense<0.000000e+00> : vector<1x32xf32>
    %147 = tpu.matmul %146, %11, %cst_68 {dimension_numbers = #tpu.dot_dimension_numbers<[1], [0], [0], [1], [0, 0, 1, 1], [], []>} : vector<1x32xf32>, vector<32x32xf32>, vector<1x32xf32> -> vector<1x32xf32>
    %cst_69 = arith.constant dense<0.000000e+00> : vector<1x32xf32>
    %148 = tpu.matmul %145, %14, %cst_69 {dimension_numbers = #tpu.dot_dimension_numbers<[1], [0], [0], [1], [0, 0, 1, 1], [], []>} : vector<1x32xf32>, vector<32x32xf32>, vector<1x32xf32> -> vector<1x32xf32>
    %149 = arith.addf %147, %148 : vector<1x32xf32>
    %150 = arith.addf %149, %17 : vector<1x32xf32>
    %151 = arith.negf %150 : vector<1x32xf32>
    %152 = math.exp %151 : vector<1x32xf32>
    %cst_70 = arith.constant 1.000000e+00 : f32
    %153 = vector.broadcast %cst_70 : f32 to vector<1x32xf32>
    %154 = arith.addf %153, %152 : vector<1x32xf32>
    %155 = arith.divf %153, %154 : vector<1x32xf32>
    %cst_71 = arith.constant dense<0.000000e+00> : vector<1x32xf32>
    %156 = tpu.matmul %146, %12, %cst_71 {dimension_numbers = #tpu.dot_dimension_numbers<[1], [0], [0], [1], [0, 0, 1, 1], [], []>} : vector<1x32xf32>, vector<32x32xf32>, vector<1x32xf32> -> vector<1x32xf32>
    %cst_72 = arith.constant dense<0.000000e+00> : vector<1x32xf32>
    %157 = tpu.matmul %145, %15, %cst_72 {dimension_numbers = #tpu.dot_dimension_numbers<[1], [0], [0], [1], [0, 0, 1, 1], [], []>} : vector<1x32xf32>, vector<32x32xf32>, vector<1x32xf32> -> vector<1x32xf32>
    %158 = arith.addf %156, %157 : vector<1x32xf32>
    %159 = arith.addf %158, %18 : vector<1x32xf32>
    %160 = arith.negf %159 : vector<1x32xf32>
    %161 = math.exp %160 : vector<1x32xf32>
    %cst_73 = arith.constant 1.000000e+00 : f32
    %162 = vector.broadcast %cst_73 : f32 to vector<1x32xf32>
    %163 = arith.addf %162, %161 : vector<1x32xf32>
    %164 = arith.divf %162, %163 : vector<1x32xf32>
    %cst_74 = arith.constant dense<0.000000e+00> : vector<1x32xf32>
    %165 = tpu.matmul %145, %16, %cst_74 {dimension_numbers = #tpu.dot_dimension_numbers<[1], [0], [0], [1], [0, 0, 1, 1], [], []>} : vector<1x32xf32>, vector<32x32xf32>, vector<1x32xf32> -> vector<1x32xf32>
    %166 = arith.addf %165, %20 : vector<1x32xf32>
    %cst_75 = arith.constant dense<0.000000e+00> : vector<1x32xf32>
    %167 = tpu.matmul %146, %13, %cst_75 {dimension_numbers = #tpu.dot_dimension_numbers<[1], [0], [0], [1], [0, 0, 1, 1], [], []>} : vector<1x32xf32>, vector<32x32xf32>, vector<1x32xf32> -> vector<1x32xf32>
    %168 = arith.addf %167, %19 : vector<1x32xf32>
    %169 = arith.mulf %155, %166 : vector<1x32xf32>
    %170 = arith.addf %168, %169 : vector<1x32xf32>
    %171 = math.tanh %170 : vector<1x32xf32>
    %cst_76 = arith.constant 1.000000e+00 : f32
    %172 = vector.broadcast %cst_76 : f32 to vector<1x32xf32>
    %173 = arith.subf %172, %164 : vector<1x32xf32>
    %174 = arith.mulf %173, %171 : vector<1x32xf32>
    %175 = arith.mulf %164, %145 : vector<1x32xf32>
    %176 = arith.addf %174, %175 : vector<1x32xf32>
    %177 = vector.extract_strided_slice %10 {offsets = [5, 0], sizes = [1, 32], strides = [1, 1]} : vector<8x32xf32> to vector<1x32xf32>
    %cst_77 = arith.constant dense<0.000000e+00> : vector<1x32xf32>
    %178 = tpu.matmul %177, %11, %cst_77 {dimension_numbers = #tpu.dot_dimension_numbers<[1], [0], [0], [1], [0, 0, 1, 1], [], []>} : vector<1x32xf32>, vector<32x32xf32>, vector<1x32xf32> -> vector<1x32xf32>
    %cst_78 = arith.constant dense<0.000000e+00> : vector<1x32xf32>
    %179 = tpu.matmul %176, %14, %cst_78 {dimension_numbers = #tpu.dot_dimension_numbers<[1], [0], [0], [1], [0, 0, 1, 1], [], []>} : vector<1x32xf32>, vector<32x32xf32>, vector<1x32xf32> -> vector<1x32xf32>
    %180 = arith.addf %178, %179 : vector<1x32xf32>
    %181 = arith.addf %180, %17 : vector<1x32xf32>
    %182 = arith.negf %181 : vector<1x32xf32>
    %183 = math.exp %182 : vector<1x32xf32>
    %cst_79 = arith.constant 1.000000e+00 : f32
    %184 = vector.broadcast %cst_79 : f32 to vector<1x32xf32>
    %185 = arith.addf %184, %183 : vector<1x32xf32>
    %186 = arith.divf %184, %185 : vector<1x32xf32>
    %cst_80 = arith.constant dense<0.000000e+00> : vector<1x32xf32>
    %187 = tpu.matmul %177, %12, %cst_80 {dimension_numbers = #tpu.dot_dimension_numbers<[1], [0], [0], [1], [0, 0, 1, 1], [], []>} : vector<1x32xf32>, vector<32x32xf32>, vector<1x32xf32> -> vector<1x32xf32>
    %cst_81 = arith.constant dense<0.000000e+00> : vector<1x32xf32>
    %188 = tpu.matmul %176, %15, %cst_81 {dimension_numbers = #tpu.dot_dimension_numbers<[1], [0], [0], [1], [0, 0, 1, 1], [], []>} : vector<1x32xf32>, vector<32x32xf32>, vector<1x32xf32> -> vector<1x32xf32>
    %189 = arith.addf %187, %188 : vector<1x32xf32>
    %190 = arith.addf %189, %18 : vector<1x32xf32>
    %191 = arith.negf %190 : vector<1x32xf32>
    %192 = math.exp %191 : vector<1x32xf32>
    %cst_82 = arith.constant 1.000000e+00 : f32
    %193 = vector.broadcast %cst_82 : f32 to vector<1x32xf32>
    %194 = arith.addf %193, %192 : vector<1x32xf32>
    %195 = arith.divf %193, %194 : vector<1x32xf32>
    %cst_83 = arith.constant dense<0.000000e+00> : vector<1x32xf32>
    %196 = tpu.matmul %176, %16, %cst_83 {dimension_numbers = #tpu.dot_dimension_numbers<[1], [0], [0], [1], [0, 0, 1, 1], [], []>} : vector<1x32xf32>, vector<32x32xf32>, vector<1x32xf32> -> vector<1x32xf32>
    %197 = arith.addf %196, %20 : vector<1x32xf32>
    %cst_84 = arith.constant dense<0.000000e+00> : vector<1x32xf32>
    %198 = tpu.matmul %177, %13, %cst_84 {dimension_numbers = #tpu.dot_dimension_numbers<[1], [0], [0], [1], [0, 0, 1, 1], [], []>} : vector<1x32xf32>, vector<32x32xf32>, vector<1x32xf32> -> vector<1x32xf32>
    %199 = arith.addf %198, %19 : vector<1x32xf32>
    %200 = arith.mulf %186, %197 : vector<1x32xf32>
    %201 = arith.addf %199, %200 : vector<1x32xf32>
    %202 = math.tanh %201 : vector<1x32xf32>
    %cst_85 = arith.constant 1.000000e+00 : f32
    %203 = vector.broadcast %cst_85 : f32 to vector<1x32xf32>
    %204 = arith.subf %203, %195 : vector<1x32xf32>
    %205 = arith.mulf %204, %202 : vector<1x32xf32>
    %206 = arith.mulf %195, %176 : vector<1x32xf32>
    %207 = arith.addf %205, %206 : vector<1x32xf32>
    %208 = vector.extract_strided_slice %10 {offsets = [6, 0], sizes = [1, 32], strides = [1, 1]} : vector<8x32xf32> to vector<1x32xf32>
    %cst_86 = arith.constant dense<0.000000e+00> : vector<1x32xf32>
    %209 = tpu.matmul %208, %11, %cst_86 {dimension_numbers = #tpu.dot_dimension_numbers<[1], [0], [0], [1], [0, 0, 1, 1], [], []>} : vector<1x32xf32>, vector<32x32xf32>, vector<1x32xf32> -> vector<1x32xf32>
    %cst_87 = arith.constant dense<0.000000e+00> : vector<1x32xf32>
    %210 = tpu.matmul %207, %14, %cst_87 {dimension_numbers = #tpu.dot_dimension_numbers<[1], [0], [0], [1], [0, 0, 1, 1], [], []>} : vector<1x32xf32>, vector<32x32xf32>, vector<1x32xf32> -> vector<1x32xf32>
    %211 = arith.addf %209, %210 : vector<1x32xf32>
    %212 = arith.addf %211, %17 : vector<1x32xf32>
    %213 = arith.negf %212 : vector<1x32xf32>
    %214 = math.exp %213 : vector<1x32xf32>
    %cst_88 = arith.constant 1.000000e+00 : f32
    %215 = vector.broadcast %cst_88 : f32 to vector<1x32xf32>
    %216 = arith.addf %215, %214 : vector<1x32xf32>
    %217 = arith.divf %215, %216 : vector<1x32xf32>
    %cst_89 = arith.constant dense<0.000000e+00> : vector<1x32xf32>
    %218 = tpu.matmul %208, %12, %cst_89 {dimension_numbers = #tpu.dot_dimension_numbers<[1], [0], [0], [1], [0, 0, 1, 1], [], []>} : vector<1x32xf32>, vector<32x32xf32>, vector<1x32xf32> -> vector<1x32xf32>
    %cst_90 = arith.constant dense<0.000000e+00> : vector<1x32xf32>
    %219 = tpu.matmul %207, %15, %cst_90 {dimension_numbers = #tpu.dot_dimension_numbers<[1], [0], [0], [1], [0, 0, 1, 1], [], []>} : vector<1x32xf32>, vector<32x32xf32>, vector<1x32xf32> -> vector<1x32xf32>
    %220 = arith.addf %218, %219 : vector<1x32xf32>
    %221 = arith.addf %220, %18 : vector<1x32xf32>
    %222 = arith.negf %221 : vector<1x32xf32>
    %223 = math.exp %222 : vector<1x32xf32>
    %cst_91 = arith.constant 1.000000e+00 : f32
    %224 = vector.broadcast %cst_91 : f32 to vector<1x32xf32>
    %225 = arith.addf %224, %223 : vector<1x32xf32>
    %226 = arith.divf %224, %225 : vector<1x32xf32>
    %cst_92 = arith.constant dense<0.000000e+00> : vector<1x32xf32>
    %227 = tpu.matmul %207, %16, %cst_92 {dimension_numbers = #tpu.dot_dimension_numbers<[1], [0], [0], [1], [0, 0, 1, 1], [], []>} : vector<1x32xf32>, vector<32x32xf32>, vector<1x32xf32> -> vector<1x32xf32>
    %228 = arith.addf %227, %20 : vector<1x32xf32>
    %cst_93 = arith.constant dense<0.000000e+00> : vector<1x32xf32>
    %229 = tpu.matmul %208, %13, %cst_93 {dimension_numbers = #tpu.dot_dimension_numbers<[1], [0], [0], [1], [0, 0, 1, 1], [], []>} : vector<1x32xf32>, vector<32x32xf32>, vector<1x32xf32> -> vector<1x32xf32>
    %230 = arith.addf %229, %19 : vector<1x32xf32>
    %231 = arith.mulf %217, %228 : vector<1x32xf32>
    %232 = arith.addf %230, %231 : vector<1x32xf32>
    %233 = math.tanh %232 : vector<1x32xf32>
    %cst_94 = arith.constant 1.000000e+00 : f32
    %234 = vector.broadcast %cst_94 : f32 to vector<1x32xf32>
    %235 = arith.subf %234, %226 : vector<1x32xf32>
    %236 = arith.mulf %235, %233 : vector<1x32xf32>
    %237 = arith.mulf %226, %207 : vector<1x32xf32>
    %238 = arith.addf %236, %237 : vector<1x32xf32>
    %239 = vector.extract_strided_slice %10 {offsets = [7, 0], sizes = [1, 32], strides = [1, 1]} : vector<8x32xf32> to vector<1x32xf32>
    %cst_95 = arith.constant dense<0.000000e+00> : vector<1x32xf32>
    %240 = tpu.matmul %239, %11, %cst_95 {dimension_numbers = #tpu.dot_dimension_numbers<[1], [0], [0], [1], [0, 0, 1, 1], [], []>} : vector<1x32xf32>, vector<32x32xf32>, vector<1x32xf32> -> vector<1x32xf32>
    %cst_96 = arith.constant dense<0.000000e+00> : vector<1x32xf32>
    %241 = tpu.matmul %238, %14, %cst_96 {dimension_numbers = #tpu.dot_dimension_numbers<[1], [0], [0], [1], [0, 0, 1, 1], [], []>} : vector<1x32xf32>, vector<32x32xf32>, vector<1x32xf32> -> vector<1x32xf32>
    %242 = arith.addf %240, %241 : vector<1x32xf32>
    %243 = arith.addf %242, %17 : vector<1x32xf32>
    %244 = arith.negf %243 : vector<1x32xf32>
    %245 = math.exp %244 : vector<1x32xf32>
    %cst_97 = arith.constant 1.000000e+00 : f32
    %246 = vector.broadcast %cst_97 : f32 to vector<1x32xf32>
    %247 = arith.addf %246, %245 : vector<1x32xf32>
    %248 = arith.divf %246, %247 : vector<1x32xf32>
    %cst_98 = arith.constant dense<0.000000e+00> : vector<1x32xf32>
    %249 = tpu.matmul %239, %12, %cst_98 {dimension_numbers = #tpu.dot_dimension_numbers<[1], [0], [0], [1], [0, 0, 1, 1], [], []>} : vector<1x32xf32>, vector<32x32xf32>, vector<1x32xf32> -> vector<1x32xf32>
    %cst_99 = arith.constant dense<0.000000e+00> : vector<1x32xf32>
    %250 = tpu.matmul %238, %15, %cst_99 {dimension_numbers = #tpu.dot_dimension_numbers<[1], [0], [0], [1], [0, 0, 1, 1], [], []>} : vector<1x32xf32>, vector<32x32xf32>, vector<1x32xf32> -> vector<1x32xf32>
    %251 = arith.addf %249, %250 : vector<1x32xf32>
    %252 = arith.addf %251, %18 : vector<1x32xf32>
    %253 = arith.negf %252 : vector<1x32xf32>
    %254 = math.exp %253 : vector<1x32xf32>
    %cst_100 = arith.constant 1.000000e+00 : f32
    %255 = vector.broadcast %cst_100 : f32 to vector<1x32xf32>
    %256 = arith.addf %255, %254 : vector<1x32xf32>
    %257 = arith.divf %255, %256 : vector<1x32xf32>
    %cst_101 = arith.constant dense<0.000000e+00> : vector<1x32xf32>
    %258 = tpu.matmul %238, %16, %cst_101 {dimension_numbers = #tpu.dot_dimension_numbers<[1], [0], [0], [1], [0, 0, 1, 1], [], []>} : vector<1x32xf32>, vector<32x32xf32>, vector<1x32xf32> -> vector<1x32xf32>
    %259 = arith.addf %258, %20 : vector<1x32xf32>
    %cst_102 = arith.constant dense<0.000000e+00> : vector<1x32xf32>
    %260 = tpu.matmul %239, %13, %cst_102 {dimension_numbers = #tpu.dot_dimension_numbers<[1], [0], [0], [1], [0, 0, 1, 1], [], []>} : vector<1x32xf32>, vector<32x32xf32>, vector<1x32xf32> -> vector<1x32xf32>
    %261 = arith.addf %260, %19 : vector<1x32xf32>
    %262 = arith.mulf %248, %259 : vector<1x32xf32>
    %263 = arith.addf %261, %262 : vector<1x32xf32>
    %264 = math.tanh %263 : vector<1x32xf32>
    %cst_103 = arith.constant 1.000000e+00 : f32
    %265 = vector.broadcast %cst_103 : f32 to vector<1x32xf32>
    %266 = arith.subf %265, %257 : vector<1x32xf32>
    %267 = arith.mulf %266, %264 : vector<1x32xf32>
    %268 = arith.mulf %257, %238 : vector<1x32xf32>
    %269 = arith.addf %267, %268 : vector<1x32xf32>
    %c0_104 = arith.constant 0 : index
    %c0_105 = arith.constant 0 : index
    %270 = vector.load %arg15[%c0_104, %c0_105] : memref<32x32xf32, #tpu.memory_space<vmem>>, vector<32x32xf32>
    %cst_106 = arith.constant dense<0.000000e+00> : vector<1x32xf32>
    %271 = tpu.matmul %269, %270, %cst_106 {dimension_numbers = #tpu.dot_dimension_numbers<[1], [0], [0], [1], [0, 0, 1, 1], [], []>} : vector<1x32xf32>, vector<32x32xf32>, vector<1x32xf32> -> vector<1x32xf32>
    %c0_107 = arith.constant 0 : index
    %c0_108 = arith.constant 0 : index
    %272 = vector.load %arg16[%c0_107, %c0_108] : memref<1x32xf32, #tpu.memory_space<vmem>>, vector<1x32xf32>
    %273 = arith.addf %271, %272 : vector<1x32xf32>
    %c0_109 = arith.constant 0 : index
    %c0_110 = arith.constant 0 : index
    %c0_111 = arith.constant 0 : index
    %274 = vector.load %arg17[%c0_109, %c0_110, %c0_111] : memref<1x1x32xf32, #tpu.memory_space<vmem>>, vector<1x1x32xf32>
    %275 = vector.shape_cast %274 : vector<1x1x32xf32> to vector<1x32xf32>
    %276 = vector.shape_cast %273 : vector<1x32xf32> to vector<1x1x32xf32>
    tpu.vector_store %arg17[%c0_109, %c0_110, %c0_111], %276 {strides = array<i32>} : memref<1x1x32xf32, #tpu.memory_space<vmem>>, vector<1x1x32xf32>,
    return
  }
  func.func @transform_0(%arg0: i32) -> (i32, i32, i32, i32) {
    %c0_i32 = arith.constant 0 : i32
    %c0_i32_0 = arith.constant 0 : i32
    %c0_i32_1 = arith.constant 0 : i32
    %c0_i32_2 = arith.constant 0 : i32
    return %arg0, %c0_i32, %c0_i32_0, %c0_i32_1 : i32, i32, i32, i32
  }
  func.func @transform_1(%arg0: i32) -> (i32, i32, i32) {
    %c0_i32 = arith.constant 0 : i32
    %c0_i32_0 = arith.constant 0 : i32
    %c0_i32_1 = arith.constant 0 : i32
    %c0_i32_2 = arith.constant 0 : i32
    return %c0_i32, %c0_i32_0, %c0_i32_1 : i32, i32, i32
  }
  func.func @transform_2(%arg0: i32) -> (i32, i32) {
    %c0_i32 = arith.constant 0 : i32
    %c0_i32_0 = arith.constant 0 : i32
    %c0_i32_1 = arith.constant 0 : i32
    return %c0_i32, %c0_i32_0 : i32, i32
  }
  func.func @transform_3(%arg0: i32) -> (i32, i32) {
    %c0_i32 = arith.constant 0 : i32
    %c0_i32_0 = arith.constant 0 : i32
    %c0_i32_1 = arith.constant 0 : i32
    return %c0_i32, %c0_i32_0 : i32, i32
  }
  func.func @transform_4(%arg0: i32) -> (i32, i32) {
    %c0_i32 = arith.constant 0 : i32
    %c0_i32_0 = arith.constant 0 : i32
    %c0_i32_1 = arith.constant 0 : i32
    return %c0_i32, %c0_i32_0 : i32, i32
  }
  func.func @transform_5(%arg0: i32) -> (i32, i32) {
    %c0_i32 = arith.constant 0 : i32
    %c0_i32_0 = arith.constant 0 : i32
    %c0_i32_1 = arith.constant 0 : i32
    return %c0_i32, %c0_i32_0 : i32, i32
  }
  func.func @transform_6(%arg0: i32) -> (i32, i32) {
    %c0_i32 = arith.constant 0 : i32
    %c0_i32_0 = arith.constant 0 : i32
    %c0_i32_1 = arith.constant 0 : i32
    return %c0_i32, %c0_i32_0 : i32, i32
  }
  func.func @transform_7(%arg0: i32) -> (i32, i32) {
    %c0_i32 = arith.constant 0 : i32
    %c0_i32_0 = arith.constant 0 : i32
    %c0_i32_1 = arith.constant 0 : i32
    return %c0_i32, %c0_i32_0 : i32, i32
  }
  func.func @transform_8(%arg0: i32) -> (i32, i32) {
    %c0_i32 = arith.constant 0 : i32
    %c0_i32_0 = arith.constant 0 : i32
    %c0_i32_1 = arith.constant 0 : i32
    return %c0_i32, %c0_i32_0 : i32, i32
  }
  func.func @transform_9(%arg0: i32) -> (i32, i32) {
    %c0_i32 = arith.constant 0 : i32
    %c0_i32_0 = arith.constant 0 : i32
    %c0_i32_1 = arith.constant 0 : i32
    return %c0_i32, %c0_i32_0 : i32, i32
  }
  func.func @transform_10(%arg0: i32) -> (i32, i32) {
    %c0_i32 = arith.constant 0 : i32
    %c0_i32_0 = arith.constant 0 : i32
    %c0_i32_1 = arith.constant 0 : i32
    return %c0_i32, %c0_i32_0 : i32, i32
  }
  func.func @transform_11(%arg0: i32) -> (i32, i32) {
    %c0_i32 = arith.constant 0 : i32
    %c0_i32_0 = arith.constant 0 : i32
    %c0_i32_1 = arith.constant 0 : i32
    return %c0_i32, %c0_i32_0 : i32, i32
  }
  func.func @transform_12(%arg0: i32) -> (i32, i32) {
    %c0_i32 = arith.constant 0 : i32
    %c0_i32_0 = arith.constant 0 : i32
    %c0_i32_1 = arith.constant 0 : i32
    return %c0_i32, %c0_i32_0 : i32, i32
  }
  func.func @transform_13(%arg0: i32) -> (i32, i32) {
    %c0_i32 = arith.constant 0 : i32
    %c0_i32_0 = arith.constant 0 : i32
    %c0_i32_1 = arith.constant 0 : i32
    return %c0_i32, %c0_i32_0 : i32, i32
  }
  func.func @transform_14(%arg0: i32) -> (i32, i32) {
    %c0_i32 = arith.constant 0 : i32
    %c0_i32_0 = arith.constant 0 : i32
    %c0_i32_1 = arith.constant 0 : i32
    return %c0_i32, %c0_i32_0 : i32, i32
  }
  func.func @transform_15(%arg0: i32) -> (i32, i32) {
    %c0_i32 = arith.constant 0 : i32
    %c0_i32_0 = arith.constant 0 : i32
    %c0_i32_1 = arith.constant 0 : i32
    return %c0_i32, %c0_i32_0 : i32, i32
  }
  func.func @transform_16(%arg0: i32) -> (i32, i32, i32) {
    %c0_i32 = arith.constant 0 : i32
    %c0_i32_0 = arith.constant 0 : i32
    %c0_i32_1 = arith.constant 0 : i32
    return %arg0, %c0_i32, %c0_i32_0 : i32, i32, i32
  }
}

</mosaic_0001>

<bundles_post_ra>
// kernel: tpu_custom_call.1
= control target key start
LH: loop header
LB: loop body
LE: loop exit
PB: predicated region body
PF: predicated region fallthrough
CT: control target
= control target key end

     0   :  { %s6652_s0 = inlined_call_operand.vmem [shape: f32[2,8,16,8], index: 0, kind: input, shape index: {}]   ;;  %s6653_s1 = inlined_call_operand.vmem [shape: f32[1,16,1], index: 1, kind: input, shape index: {}]   ;;  %s6654_s2 = inlined_call_operand.vmem [shape: f32[8,32], index: 2, kind: input, shape index: {}]   ;;  %s6655_s3 = inlined_call_operand.vmem [shape: f32[1,32], index: 3, kind: input, shape index: {}]   ;;  %s6656_s4 = inlined_call_operand.vmem [shape: f32[32,32], index: 4, kind: input, shape index: {}]   ;;  %s6657_s5 = inlined_call_operand.vmem [shape: f32[32,32], index: 5, kind: input, shape index: {}]   ;;  %s6658_s6 = inlined_call_operand.vmem [shape: f32[32,32], index: 6, kind: input, shape index: {}]   ;;  %s6659_s7 = inlined_call_operand.vmem [shape: f32[32,32], index: 7, kind: input, shape index: {}]   ;;  %s6660_s8 = inlined_call_operand.vmem [shape: f32[32,32], index: 8, kind: input, shape index: {}]   ;;  %s6661_s9 = inlined_call_operand.vmem [shape: f32[32,32], index: 9, kind: input, shape index: {}]   ;;  %s6662_s10 = inlined_call_operand.vmem [shape: f32[1,32], index: 10, kind: input, shape index: {}]   ;;  %s6663_s11 = inlined_call_operand.vmem [shape: f32[1,32], index: 11, kind: input, shape index: {}]   ;;  %s6664_s12 = inlined_call_operand.vmem [shape: f32[1,32], index: 12, kind: input, shape index: {}]   ;;  %s6665_s13 = inlined_call_operand.vmem [shape: f32[1,32], index: 13, kind: input, shape index: {}]   ;;  %s6666_s14 = inlined_call_operand.vmem [shape: f32[32,32], index: 14, kind: input, shape index: {}]   ;;  %s6667_s15 = inlined_call_operand.vmem [shape: f32[1,32], index: 15, kind: input, shape index: {}]   ;;  %s6668_s16 = inlined_call_operand.hbm [shape: f32[2,1,32], index: 16, kind: output, shape index: {}]  }
   0x1   :  { %6669 = sst [smem:[#allocation5_spill]] %s6652_s0 }
   0x2   :  { %6670 = sst [smem:[#allocation6_spill]] %s6653_s1 }
   0x3   :  { %6671 = sst [smem:[#allocation7_spill]] %s6654_s2 }
   0x4   :  { %6672 = sst [smem:[#allocation8_spill]] %s6655_s3 }
   0x5   :  { %6673 = sst [smem:[#allocation9_spill]] %s6656_s4 }
   0x6   :  { %6674 = sst [smem:[#allocation10_spill]] %s6657_s5 }
   0x7   :  { %21 = vsyncpa [#allocation3], 0 }
   0x8   :  { %23 = vsyncpa [#allocation3 + $0x1], 0  ;;  %s5642_s21 = smov 0   ;;  %s5644_s22 = smov 0  }
   0x9   :  { %s5646_s23 = smov 0   ;;  %s5648_s24 = smov 0  }
   0xa LB: > { %s5663_s25 = sadd.s32 4294967295, %s5551_s24   ;;  %s4491_s26 = sadd.s32 4294967294, %s5551_s24   ;;  %s5551_s24 = sphi %s5648_s24, %s6686_s24   ;;  %s5547_s23 = sphi %s5646_s23, %s6685_s23   ;;  %s5543_s22 = sphi %s5644_s22, %s6684_s22   ;;  %s5539_s21 = sphi %s5642_s21, %s6683_s21  }
   0xb   : > { %s5667_s27 = sadd.s32 1, %s5551_s24   ;;  %s377_s28 = sadd.s32 1, %s5547_s23 }
   0xc   : > { %s374_s29 = ssub.s32 %s5551_s24, %s5667_s27  ;;  %p387_p0 = scmp.ne.s32.totalorder %s5547_s23, %s5543_s22 }
   0xd   : > { %p375_p1 = scmp.eq.s32.totalorder %s374_s29, 0  ;;  %p388_p2 = scmp.eq.s32.totalorder %s5663_s25, 1 }
   0xe   : > { %p393_p3 = scmp.ne.s32.totalorder %s5543_s22, %s5539_s21  ;;  %p394_p4 = scmp.eq.s32.totalorder %s4491_s26, 1 }
   0xf   : > { %s5678_s30 = scalar_select %p375_p1, %s5547_s23, %s377_s28  }
  0x10   : > { %p5680_p5 = por %p388_p2, %p387_p0  ;;  %p5684_p6 = por %p394_p4, %p393_p3 }
  0x11   : > { %p4494_p7 = scmp.ge.s32.totalorder %s5551_s24, 1  ;;  %p465_p8 = scmp.lt.s32.totalorder %s5551_s24, 3 }
  0x13   : > { %p466_p9 = pnand %p4494_p7, %p465_p8 }
  0x14   : > { %s6677_s1 = sld [smem:[#allocation6_spill]] (!%p466_p9)  ;;  %p514_p10 = scmp.lt.s32.totalorder (!%p466_p9), %s5663_s25, 1 }
  0x15   : > { %469 = sbr.rel (%p466_p9) target bundleno = 2591 (0xa1f), region = 84  ;;  %s6678_s2 = sld [smem:[#allocation7_spill]] (!%p466_p9) }
  0x16   : > { %s6680_s4 = sld [smem:[#allocation9_spill]] (!%p466_p9)  ;;  %s4561_s26 = sshll.u32 (!%p466_p9), %s5663_s25, 4 }
  0x17   : > { %s6681_s3 = sld [smem:[#allocation8_spill]] (!%p466_p9) }
  0x18   : > { %s6682_s5 = sld [smem:[#allocation10_spill]] (!%p466_p9) }
  0x1a   : > { %v535_v0 = vld [vmem:[%s6677_s1] sm:$0xff]  ;;  %v5553_v1 = vmov 0   ;;  %v536_v2 = vld [vmem:[%s6677_s1 + $0x8] sm:$0xff]  ;;  %v5554_v4 = vmov 0.0   ;;  %vm5555_vm0 = vmmov 0   ;;  %v5709_v5 = vld [vmem:[%s6659_s7 + $0x18] sm:$0xff] }
  0x1b   : > { %5398 = vset.pattern.permute.xlu0 %v5553_v1  ;;  %v636_v3 = vld [vmem:[%s6678_s2] sm:$0xff]  ;;  %4812 = vmatprep.subr.mxu0 %v5554_v4  ;;  %v5715_v6 = vld [vmem:[%s6659_s7 + $0x10] sm:$0xff]  ;;  %v5722_v7 = vld [vmem:[%s6659_s7 + $0x8] sm:$0xff]  ;;  %s515_s18 = scalar_select %p514_p10, %s5663_s25, 1  ;;  %vm563_vm1 = vcmask 64512   ;;  %vm652_vm2 = vcmask 1041409  }
  0x1c   : > { %539 = vperm.xlu0 %5398, %v535_v0   ;;  %4814 = vmatprep.mubr.msk.f32.mxu0 %vm5555_vm0, %v5554_v4  ;;  %s6679_s1 = sld [smem:[#allocation5_spill]]  ;;  %vm654_vm3 = vcmask 1042434   ;;  %vm656_vm4 = vcmask 1043459   ;;  %vm658_vm5 = vcmask 1044484   ;;  %vm660_vm6 = vcmask 1045509   ;;  %s5556_s25 = smov [#allocation2]  }
  0x1d   : > { %4813 = vmatpush3.msra.mxu0 %v636_v3  ;;  %4817 = vmatprep.subr.mxu1 %v5554_v4  ;;  %s4564_s19 = sshll.u32 %s515_s18, 7  ;;  %vm662_vm7 = vcmask 1046534   ;;  %vm664_vm8 = vcmask 1047559   ;;  %vm766_vm9 = vcmask 261120   ;;  %s512_s18 = sand.u32 1, %s5543_s22   ;;  %vm4421_vm10 = vcmask 253952  }
  0x1e   : > { %4828 = vmatprep.subr.mxu0 %v5554_v4  ;;  %4825 = vmatprep.mubr.msk.f32.mxu1 %vm5555_vm0, %v5554_v4 }
  0x1f   : > { %4818 = vmatpush3.msra.mxu1 %v5709_v5 }
  0x20   : > { %544 = vperm.xlu0 %5398, %v536_v2   ;;  %4819 = vmatprep.subr.mxu1 %v5554_v4 }
  0x21   : > { %4820 = vmatpush3.msra.mxu1 %v5715_v6 }
  0x22   : > { %4821 = vmatprep.subr.mxu1 %v5554_v4  ;;  %s518_s2 = scalar_lea.vmem %s6679_s1, %s4564_s19  ;;  %s513_s1 = scalar_lea.vmem [#allocation2], %s512_s18 }
  0x23   : > { %4822 = vmatpush3.msra.mxu1 %v5722_v7  ;;  %v519_v8 = vld [vmem:[%s518_s2] sm:$0xff]  ;;  %v521_v9 = vld [vmem:[%s518_s2 + $0x10] sm:$0xff]  ;;  %v520_v21 = vld [vmem:[%s518_s2 + $0x8] sm:$0xff]  ;;  %s5495_s19 = sshll.u32 %s5556_s25, 4  ;;  %s5496_s19 = int_to_ptr.vmem [resolvable:$false] %s5495_s19 }
  0x24   : > { %4823 = vmatprep.subr.mxu1 %v5554_v4  ;;  %v523_v10 = vld [vmem:[%s518_s2 + $0x20] sm:$0xff]  ;;  %v525_v11 = vld [vmem:[%s518_s2 + $0x30] sm:$0xff]  ;;  %v522_v22 = vld [vmem:[%s518_s2 + $0x18] sm:$0xff]  ;;  %s5497_s20 = scalar_lea.vmem %s5496_s19, 32 }
  0x25   : > { %v527_v12 = vld [vmem:[%s518_s2 + $0x40] sm:$0xff]  ;;  %v529_v13 = vld [vmem:[%s518_s2 + $0x50] sm:$0xff]  ;;  %v524_v23 = vld [vmem:[%s518_s2 + $0x28] sm:$0xff] }
  0x26   : > { %v531_v14 = vld [vmem:[%s518_s2 + $0x60] sm:$0xff]  ;;  %v533_v15 = vld [vmem:[%s518_s2 + $0x70] sm:$0xff]  ;;  %v526_v26 = vld [vmem:[%s518_s2 + $0x38] sm:$0xff] }
  0x27   : > { %v528_v27 = vld [vmem:[%s518_s2 + $0x48] sm:$0xff]  ;;  %v530_v28 = vld [vmem:[%s518_s2 + $0x58] sm:$0xff] }
  0x28   : > { %v532_v31 = vld [vmem:[%s518_s2 + $0x68] sm:$0xff]  ;;  %v534_v32 = vld [vmem:[%s518_s2 + $0x78] sm:$0xff]  ;;  %s4436_s2 = sshll.u32 %s513_s1, 4  ;;  %s4437_s2 = int_to_ptr.vmem [resolvable:$true] %s4436_s2 }
  0x29   : > { %p5498_p0 = scmp.lt.s32.totalorder %s4437_s2, %s5496_s19 }
  0x97   : > { %v540_v16 = vpop.permute.xlu0 %539 }
  0x98   : > { %v547_v17 = vmul.f32 %v540_v16, %v519_v8  ;;  %v549_v18 = vmul.f32 %v540_v16, %v521_v9  ;;  %v551_v19 = vmul.f32 %v540_v16, %v523_v10  ;;  %v553_v20 = vmul.f32 %v540_v16, %v525_v11 }
  0x99   : > { %v555_v24 = vmul.f32 %v540_v16, %v527_v12  ;;  %v557_v25 = vmul.f32 %v540_v16, %v529_v13  ;;  %v559_v29 = vmul.f32 %v540_v16, %v531_v14  ;;  %v561_v30 = vmul.f32 %v540_v16, %v533_v15 }
  0x9a   : > { %v564_v33 = vsel %vm563_vm1, %v547_v17, 0.0  ;;  %v573_v34 = vsel %vm563_vm1, %v549_v18, 0.0  ;;  %v582_v35 = vsel %vm563_vm1, %v551_v19, 0.0  ;;  %v591_v36 = vsel %vm563_vm1, %v553_v20, 0.0 }
  0x9b   : > { %v545_v37 = vpop.permute.xlu0 %544  ;;  %v600_v38 = vsel %vm563_vm1, %v555_v24, 0.0  ;;  %v609_v39 = vsel %vm563_vm1, %v557_v25, 0.0  ;;  %v618_v40 = vsel %vm563_vm1, %v559_v29, 0.0  ;;  %v627_v41 = vsel %vm563_vm1, %v561_v30, 0.0 }
  0x9c   : > { %v548_v42 = vmul.f32 %v545_v37, %v520_v21  ;;  %v550_v43 = vmul.f32 %v545_v37, %v522_v22  ;;  %v552_v44 = vmul.f32 %v545_v37, %v524_v23  ;;  %v554_v45 = vmul.f32 %v545_v37, %v526_v26 }
  0x9d   : > { %v556_v46 = vmul.f32 %v545_v37, %v528_v27  ;;  %v558_v47 = vmul.f32 %v545_v37, %v530_v28  ;;  %v560_v48 = vmul.f32 %v545_v37, %v532_v31  ;;  %v562_v49 = vmul.f32 %v545_v37, %v534_v32 }
  0x9e   : > { %v565_v50 = vsel %vm563_vm1, %v548_v42, 0.0  ;;  %v574_v51 = vsel %vm563_vm1, %v550_v43, 0.0  ;;  %v583_v52 = vsel %vm563_vm1, %v552_v44, 0.0  ;;  %v592_v53 = vsel %vm563_vm1, %v554_v45, 0.0 }
  0x9f   : > { %v566_v54 = vadd.f32 %v565_v50, %v564_v33  ;;  %v575_v55 = vadd.f32 %v574_v51, %v573_v34  ;;  %v584_v56 = vadd.f32 %v583_v52, %v582_v35  ;;  %v593_v57 = vadd.f32 %v592_v53, %v591_v36 }
  0xa0   : > { %v601_v58 = vsel %vm563_vm1, %v556_v46, 0.0  ;;  %v610_v59 = vsel %vm563_vm1, %v558_v47, 0.0  ;;  %v619_v60 = vsel %vm563_vm1, %v560_v48, 0.0  ;;  %v628_v61 = vsel %vm563_vm1, %v562_v49, 0.0 }
  0xa1   : > { %v567_v62 = vrot.slane %v566_v54, 4  ;;  %v576_v63 = vrot.slane %v575_v55, 4  ;;  %v585_v0 = vrot.slane %v584_v56, 4  ;;  %v594_v1 = vrot.slane %v593_v57, 4 }
  0xa2   : > { %v602_v2 = vadd.f32 %v601_v58, %v600_v38  ;;  %v611_v3 = vadd.f32 %v610_v59, %v609_v39  ;;  %v620_v8 = vadd.f32 %v619_v60, %v618_v40  ;;  %v629_v9 = vadd.f32 %v628_v61, %v627_v41  ;;  %v5752_v60 = vld [vmem:[%s6680_s4 + $0x18] sm:$0xff] }
  0xa3   : > { %v568_v10 = vadd.f32 %v567_v62, %v566_v54  ;;  %v577_v11 = vadd.f32 %v576_v63, %v575_v55  ;;  %v586_v12 = vadd.f32 %v585_v0, %v584_v56  ;;  %v595_v13 = vadd.f32 %v594_v1, %v593_v57  ;;  %v5758_v62 = vld [vmem:[%s6680_s4 + $0x10] sm:$0xff]  ;;  %v5767_v63 = vld [vmem:[%s6680_s4 + $0x8] sm:$0xff]  ;;  %v5776_v0 = vld [vmem:[%s6659_s7] sm:$0xff] }
  0xa4   : > { %v603_v14 = vrot.slane %v602_v2, 4  ;;  %v612_v15 = vrot.slane %v611_v3, 4  ;;  %v621_v16 = vrot.slane %v620_v8, 4  ;;  %v630_v17 = vrot.slane %v629_v9, 4  ;;  %v5781_v1 = vld [vmem:[%s6680_s4] sm:$0xff]  ;;  %4824 = vmatpush3.msra.mxu1 %v5776_v0  ;;  %s4424_s4 = scalar_lea.sflag [#allocation3], %s512_s18 }
  0xa5   : > { %v569_v18 = vrot.slane %v568_v10, 2  ;;  %v578_v19 = vrot.slane %v577_v11, 2  ;;  %v587_v20 = vrot.slane %v586_v12, 2  ;;  %v596_v21 = vrot.slane %v595_v13, 2  ;;  %4826 = vmatmul.mubr.f32.vlgmr.msra.gmra.mxu1 %v5554_v4  ;;  %4839 = vmatprep.subr.mxu1 %v5554_v4 }
  0xa6   : > { %v604_v22 = vadd.f32 %v603_v14, %v602_v2  ;;  %v613_v23 = vadd.f32 %v612_v15, %v611_v3  ;;  %v622_v24 = vadd.f32 %v621_v16, %v620_v8  ;;  %v631_v25 = vadd.f32 %v630_v17, %v629_v9  ;;  %v5790_v2 = vld [vmem:[%s6660_s8 + $0x18] sm:$0xff]  ;;  %v5798_v3 = vld [vmem:[%s6660_s8 + $0x10] sm:$0xff]  ;;  %4847 = vmatprep.mubr.msk.f32.mxu1 %vm5555_vm0, %v5554_v4  ;;  %v5807_v8 = vld [vmem:[%s6660_s8 + $0x8] sm:$0xff] }
  0xa7   : > { %v570_v26 = vadd.f32 %v569_v18, %v568_v10  ;;  %v579_v27 = vadd.f32 %v578_v19, %v577_v11  ;;  %v588_v28 = vadd.f32 %v587_v20, %v586_v12  ;;  %v597_v29 = vadd.f32 %v596_v21, %v595_v13  ;;  %4840 = vmatpush3.msra.mxu1 %v5790_v2  ;;  %v5814_v9 = vld [vmem:[%s6660_s8] sm:$0xff]  ;;  %v5824_v10 = vld [vmem:[%s6661_s9 + $0x18] sm:$0xff]  ;;  %v5831_v11 = vld [vmem:[%s6661_s9 + $0x10] sm:$0xff] }
  0xa8   : > { %v605_v30 = vrot.slane %v604_v22, 2  ;;  %v614_v31 = vrot.slane %v613_v23, 2  ;;  %v623_v32 = vrot.slane %v622_v24, 2  ;;  %v632_v33 = vrot.slane %v631_v25, 2  ;;  %4841 = vmatprep.subr.mxu1 %v5554_v4  ;;  %v5838_v12 = vld [vmem:[%s6661_s9 + $0x8] sm:$0xff]  ;;  %v5845_v13 = vld [vmem:[%s6661_s9] sm:$0xff] }
  0xa9   : > { %v571_v34 = vrot.slane %v570_v26, 1  ;;  %v580_v35 = vrot.slane %v579_v27, 1  ;;  %v589_v36 = vrot.slane %v588_v28, 1  ;;  %v598_v37 = vrot.slane %v597_v29, 1  ;;  %4842 = vmatpush3.msra.mxu1 %v5798_v3  ;;  %v5875_v16 = vld [vmem:[%s6682_s5 + $0x10] sm:$0xff]  ;;  %v5884_v17 = vld [vmem:[%s6682_s5 + $0x8] sm:$0xff] }
  0xaa   : > { %v606_v38 = vadd.f32 %v605_v30, %v604_v22  ;;  %v615_v39 = vadd.f32 %v614_v31, %v613_v23  ;;  %v624_v40 = vadd.f32 %v623_v32, %v622_v24  ;;  %v633_v41 = vadd.f32 %v632_v33, %v631_v25  ;;  %4843 = vmatprep.subr.mxu1 %v5554_v4  ;;  %v5891_v18 = vld [vmem:[%s6682_s5] sm:$0xff]  ;;  %v5898_v19 = vld [vmem:[%s6658_s6 + $0x18] sm:$0xff]  ;;  %v5907_v20 = vld [vmem:[%s6658_s6 + $0x10] sm:$0xff] }
  0xab   : > { %v572_v42 = vadd.f32 %v571_v34, %v570_v26  ;;  %v581_v43 = vadd.f32 %v580_v35, %v579_v27  ;;  %v590_v44 = vadd.f32 %v589_v36, %v588_v28  ;;  %v599_v49 = vadd.f32 %v598_v37, %v597_v29  ;;  %4844 = vmatpush3.msra.mxu1 %v5807_v8  ;;  %v5916_v21 = vld [vmem:[%s6658_s6 + $0x8] sm:$0xff]  ;;  %v5923_v22 = vld [vmem:[%s6658_s6] sm:$0xff] }
  0xac   : > { %v607_v45 = vrot.slane %v606_v38, 1  ;;  %v616_v46 = vrot.slane %v615_v39, 1  ;;  %v625_v47 = vrot.slane %v624_v40, 1  ;;  %v634_v50 = vrot.slane %v633_v41, 1  ;;  %4845 = vmatprep.subr.mxu1 %v5554_v4  ;;  %v6177_v36 = vld [vmem:[%s6662_s10] sm:$0x1] }
  0xad   : > { %v653_v48 = vsel %vm652_vm2, %v581_v43, %v572_v42  ;;  %4846 = vmatpush3.msra.mxu1 %v5814_v9  ;;  %v6184_v42 = vld [vmem:[%s6663_s11] sm:$0x1] }
  0xae   : > { %v608_v51 = vadd.f32 %v607_v45, %v606_v38  ;;  %v655_v52 = vsel %vm654_vm3, %v590_v44, %v653_v48  ;;  %v617_v53 = vadd.f32 %v616_v46, %v615_v39  ;;  %v626_v55 = vadd.f32 %v625_v47, %v624_v40  ;;  %4848 = vmatmul.mubr.f32.vlgmr.msra.gmra.mxu1 %v5554_v4 }
  0xaf   : > { %v657_v54 = vsel %vm656_vm4, %v599_v49, %v655_v52  ;;  %v635_v57 = vadd.f32 %v634_v50, %v633_v41  ;;  %4861 = vmatprep.subr.mxu1 %v5554_v4  ;;  %4869 = vmatprep.mubr.msk.f32.mxu1 %vm5555_vm0, %v5554_v4 }
  0xb0   : > { %v659_v56 = vsel %vm658_vm5, %v608_v51, %v657_v54  ;;  %4862 = vmatpush3.msra.mxu1 %v5824_v10 }
  0xb1   : > { %v661_v58 = vsel %vm660_vm6, %v617_v53, %v659_v56  ;;  %4863 = vmatprep.subr.mxu1 %v5554_v4 }
  0xb2   : > { %v663_v59 = vsel %vm662_vm7, %v626_v55, %v661_v58  ;;  %4864 = vmatpush3.msra.mxu1 %v5831_v11  ;;  %v6193_v55 = vld [vmem:[%s6665_s13] sm:$0x1] }
  0xb3   : > { %v665_v61 = vsel %vm664_vm8, %v635_v57, %v663_v59  ;;  %4865 = vmatprep.subr.mxu1 %v5554_v4  ;;  %v6202_v59 = vld [vmem:[%s6664_s12] sm:$0x1] }
  0xb4   : > { %4815 = vmatmul.mubr.msk.f32.vlgmr.msra.gmra.mxu0 %vm563_vm1, %v665_v61  ;;  %4866 = vmatpush3.msra.mxu1 %v5838_v12 }
  0xb5   : > { %4829 = vmatpush3.msra.mxu0 %v5752_v60  ;;  %4836 = vmatprep.mubr.msk.f32.mxu0 %vm5555_vm0, %v5554_v4 }
  0xb6   : > { %4830 = vmatprep.subr.mxu0 %v5554_v4  ;;  %4867 = vmatprep.subr.mxu1 %v5554_v4 }
  0xb7   : > { %4831 = vmatpush3.msra.mxu0 %v5758_v62  ;;  %4868 = vmatpush3.msra.mxu1 %v5845_v13 }
  0xb8   : > { %4832 = vmatprep.subr.mxu0 %v5554_v4  ;;  %4870 = vmatmul.mubr.f32.vlgmr.msra.gmra.mxu1 %v5554_v4 }
  0xb9   : > { %4833 = vmatpush3.msra.mxu0 %v5767_v63  ;;  %4883 = vmatprep.subr.mxu1 %v5554_v4 }
  0xba   : > { %4834 = vmatprep.subr.mxu0 %v5554_v4  ;;  %4884 = vmatpush3.msra.mxu1 %v5709_v5  ;;  %v4497_v5 = vld [vmem:[%s6681_s3] ss:$0 sm:$0xff]  ;;  %s6617_s3 = scalar_lea.hbm %s6668_s16, %s4561_s26 }
  0xbb   : > { %4835 = vmatpush3.msra.mxu0 %v5781_v1  ;;  %4891 = vmatprep.mubr.msk.f32.mxu1 %vm5555_vm0, %v5554_v4 }
  0xbc   : > { %4850 = vmatprep.subr.mxu0 %v5554_v4  ;;  %4885 = vmatprep.subr.mxu1 %v5554_v4 }
  0xbd   : > { %4886 = vmatpush3.msra.mxu1 %v5715_v6  ;;  %v5868_v6 = vld [vmem:[%s6682_s5 + $0x18] sm:$0xff]  ;;  %s5491_s5 = scalar_lea.vmem %s4437_s2, 16 }
  0xbe   : > { %4887 = vmatprep.subr.mxu1 %v5554_v4  ;;  %p5492_p11 = scmp.ne.s32.totalorder %s4437_s2, %s5491_s5  ;;  %p5499_p1 = scmp.lt.s32.totalorder %s5497_s20, %s5491_s5 }
  0xbf   : > { %4888 = vmatpush3.msra.mxu1 %v5722_v7 }
  0xc0   : > { %4889 = vmatprep.subr.mxu1 %v5554_v4  ;;  %p5493_p12 = pnand %p5492_p11, %p5680_p5  ;;  %p5500_p2 = por %p5499_p1, %p5498_p0 }
  0xc1   : > { %4890 = vmatpush3.msra.mxu1 %v5776_v0 }
  0xc2   : > { %4905 = vmatprep.subr.mxu1 %v5554_v4  ;;  %p5494_p13 = pneg %p5493_p12 }
  0xc4   : > { %p5501_p3 = pnand %p5500_p2, %p5494_p13 }
 0x165   : > { %v5999_v25 = vpop.f32.mrf.mxu1 }
 0x167   : > { %v4827_v26 = vpop.f32.mrf.mxu1 }
 0x16e   : > { %v6016_v28 = vpop.f32.mrf.mxu1 }
 0x170   : > { %v4849_v29 = vpop.f32.mrf.mxu1 }
 0x174   : > { %v734_v14 = vpop.f32.mrf.mxu0 }
 0x175   : > { %v5863_v15 = vadd.f32 %v4497_v5, %v734_v14 }
 0x176   : > { %v4816_v7 = vpop.f32.mrf.mxu0 }
 0x177   : > { %4837 = vmatmul.mubr.msk.f32.vlgmr.msra.gmra.mxu0 %vm766_vm9, %v5863_v15  ;;  %v1287_v23 = vrot.slane %v5863_v15, 1  ;;  %v1734_v24 = vrot.slane %v5863_v15, 2  ;;  %v2181_v27 = vrot.slane %v5863_v15, 3  ;;  %v2628_v30 = vrot.slane %v5863_v15, 4 }
 0x178   : > { %4851 = vmatpush3.msra.mxu0 %v5868_v6  ;;  %4858 = vmatprep.mubr.msk.f32.mxu0 %vm5555_vm0, %v5554_v4  ;;  %v6052_v31 = vpop.f32.mrf.mxu1  ;;  %v3075_v33 = vrot.slane %v5863_v15, 5  ;;  %v3522_v34 = vrot.slane %v5863_v15, 6  ;;  %v3969_v35 = vrot.slane %v5863_v15, 7 }
 0x179   : > { %4852 = vmatprep.subr.mxu0 %v5554_v4  ;;  %v1134_v58 = vadd.f32 %v6052_v31, %v6193_v55 }
 0x17a   : > { %4853 = vmatpush3.msra.mxu0 %v5875_v16  ;;  %v4871_v32 = vpop.f32.mrf.mxu1 }
 0x17b   : > { %4854 = vmatprep.subr.mxu0 %v5554_v4 }
 0x17c   : > { %4855 = vmatpush3.msra.mxu0 %v5884_v17 }
 0x17d   : > { %4856 = vmatprep.subr.mxu0 %v5554_v4 }
 0x17e   : > { %4857 = vmatpush3.msra.mxu0 %v5891_v18 }
 0x17f   : > { %4859 = vmatmul.mubr.msk.f32.vlgmr.msra.gmra.mxu0 %vm766_vm9, %v5863_v15  ;;  %4872 = vmatprep.subr.mxu0 %v5554_v4 }
 0x180   : > { %4873 = vmatpush3.msra.mxu0 %v5898_v19  ;;  %4880 = vmatprep.mubr.msk.f32.mxu0 %vm5555_vm0, %v5554_v4 }
 0x181   : > { %4874 = vmatprep.subr.mxu0 %v5554_v4 }
 0x182   : > { %4875 = vmatpush3.msra.mxu0 %v5907_v20 }
 0x183   : > { %4876 = vmatprep.subr.mxu0 %v5554_v4 }
 0x184   : > { %4877 = vmatpush3.msra.mxu0 %v5916_v21 }
 0x185   : > { %4878 = vmatprep.subr.mxu0 %v5554_v4 }
 0x186   : > { %4879 = vmatpush3.msra.mxu0 %v5923_v22 }
 0x187   : > { %4881 = vmatmul.mubr.msk.f32.vlgmr.msra.gmra.mxu0 %vm766_vm9, %v5863_v15  ;;  %4894 = vmatprep.subr.mxu0 %v5554_v4 }
 0x188   : > { %4895 = vmatpush3.msra.mxu0 %v5752_v60  ;;  %4902 = vmatprep.mubr.msk.f32.mxu0 %vm5555_vm0, %v5554_v4 }
 0x189   : > { %4896 = vmatprep.subr.mxu0 %v5554_v4 }
 0x18a   : > { %4897 = vmatpush3.msra.mxu0 %v5758_v62 }
 0x18b   : > { %4898 = vmatprep.subr.mxu0 %v5554_v4 }
 0x18c   : > { %4899 = vmatpush3.msra.mxu0 %v5767_v63 }
 0x18d   : > { %4900 = vmatprep.subr.mxu0 %v5554_v4 }
 0x18e   : > { %4901 = vmatpush3.msra.mxu0 %v5781_v1 }
 0x18f   : > { %4903 = vmatmul.mubr.msk.f32.vlgmr.msra.gmra.mxu0 %vm766_vm9, %v1287_v23  ;;  %4916 = vmatprep.subr.mxu0 %v5554_v4 }
 0x190   : > { %4917 = vmatpush3.msra.mxu0 %v5868_v6  ;;  %4924 = vmatprep.mubr.msk.f32.mxu0 %vm5555_vm0, %v5554_v4 }
 0x191   : > { %4918 = vmatprep.subr.mxu0 %v5554_v4 }
 0x192   : > { %4919 = vmatpush3.msra.mxu0 %v5875_v16 }
 0x193   : > { %4920 = vmatprep.subr.mxu0 %v5554_v4 }
 0x194   : > { %4921 = vmatpush3.msra.mxu0 %v5884_v17 }
 0x195   : > { %4922 = vmatprep.subr.mxu0 %v5554_v4 }
 0x196   : > { %4923 = vmatpush3.msra.mxu0 %v5891_v18 }
 0x197   : > { %4925 = vmatmul.mubr.msk.f32.vlgmr.msra.gmra.mxu0 %vm766_vm9, %v1287_v23  ;;  %4938 = vmatprep.subr.mxu0 %v5554_v4 }
 0x198   : > { %4939 = vmatpush3.msra.mxu0 %v5898_v19  ;;  %4946 = vmatprep.mubr.msk.f32.mxu0 %vm5555_vm0, %v5554_v4 }
 0x199   : > { %4940 = vmatprep.subr.mxu0 %v5554_v4 }
 0x19a   : > { %4941 = vmatpush3.msra.mxu0 %v5907_v20 }
 0x19b   : > { %4942 = vmatprep.subr.mxu0 %v5554_v4 }
 0x19c   : > { %4943 = vmatpush3.msra.mxu0 %v5916_v21 }
 0x19d   : > { %4944 = vmatprep.subr.mxu0 %v5554_v4 }
 0x19e   : > { %4945 = vmatpush3.msra.mxu0 %v5923_v22 }
 0x19f   : > { %4947 = vmatmul.mubr.msk.f32.vlgmr.msra.gmra.mxu0 %vm766_vm9, %v1287_v23  ;;  %4960 = vmatprep.subr.mxu0 %v5554_v4 }
 0x1a0   : > { %4961 = vmatpush3.msra.mxu0 %v5752_v60  ;;  %4968 = vmatprep.mubr.msk.f32.mxu0 %vm5555_vm0, %v5554_v4 }
 0x1a1   : > { %4962 = vmatprep.subr.mxu0 %v5554_v4 }
 0x1a2   : > { %4963 = vmatpush3.msra.mxu0 %v5758_v62 }
 0x1a3   : > { %4964 = vmatprep.subr.mxu0 %v5554_v4 }
 0x1a4   : > { %4965 = vmatpush3.msra.mxu0 %v5767_v63 }
 0x1a5   : > { %4966 = vmatprep.subr.mxu0 %v5554_v4 }
 0x1a6   : > { %4967 = vmatpush3.msra.mxu0 %v5781_v1 }
 0x1a7   : > { %4969 = vmatmul.mubr.msk.f32.vlgmr.msra.gmra.mxu0 %vm766_vm9, %v1734_v24  ;;  %4982 = vmatprep.subr.mxu0 %v5554_v4 }
 0x1a8   : > { %4983 = vmatpush3.msra.mxu0 %v5868_v6  ;;  %4990 = vmatprep.mubr.msk.f32.mxu0 %vm5555_vm0, %v5554_v4 }
 0x1a9   : > { %4984 = vmatprep.subr.mxu0 %v5554_v4 }
 0x1aa   : > { %4985 = vmatpush3.msra.mxu0 %v5875_v16 }
 0x1ab   : > { %4986 = vmatprep.subr.mxu0 %v5554_v4 }
 0x1ac   : > { %4987 = vmatpush3.msra.mxu0 %v5884_v17 }
 0x1ad   : > { %4988 = vmatprep.subr.mxu0 %v5554_v4 }
 0x1ae   : > { %4989 = vmatpush3.msra.mxu0 %v5891_v18 }
 0x1af   : > { %4991 = vmatmul.mubr.msk.f32.vlgmr.msra.gmra.mxu0 %vm766_vm9, %v1734_v24  ;;  %5004 = vmatprep.subr.mxu0 %v5554_v4 }
 0x1b0   : > { %5005 = vmatpush3.msra.mxu0 %v5898_v19  ;;  %5012 = vmatprep.mubr.msk.f32.mxu0 %vm5555_vm0, %v5554_v4 }
 0x1b1   : > { %5006 = vmatprep.subr.mxu0 %v5554_v4 }
 0x1b2   : > { %5007 = vmatpush3.msra.mxu0 %v5907_v20 }
 0x1b3   : > { %5008 = vmatprep.subr.mxu0 %v5554_v4 }
 0x1b4   : > { %5009 = vmatpush3.msra.mxu0 %v5916_v21 }
 0x1b5   : > { %5010 = vmatprep.subr.mxu0 %v5554_v4 }
 0x1b6   : > { %5011 = vmatpush3.msra.mxu0 %v5923_v22 }
 0x1b7   : > { %5013 = vmatmul.mubr.msk.f32.vlgmr.msra.gmra.mxu0 %vm766_vm9, %v1734_v24  ;;  %5026 = vmatprep.subr.mxu0 %v5554_v4 }
 0x1b8   : > { %5027 = vmatpush3.msra.mxu0 %v5752_v60  ;;  %5034 = vmatprep.mubr.msk.f32.mxu0 %vm5555_vm0, %v5554_v4 }
 0x1b9   : > { %5028 = vmatprep.subr.mxu0 %v5554_v4 }
 0x1ba   : > { %5029 = vmatpush3.msra.mxu0 %v5758_v62 }
 0x1bb   : > { %5030 = vmatprep.subr.mxu0 %v5554_v4 }
 0x1bc   : > { %5031 = vmatpush3.msra.mxu0 %v5767_v63 }
 0x1bd   : > { %5032 = vmatprep.subr.mxu0 %v5554_v4 }
 0x1be   : > { %5033 = vmatpush3.msra.mxu0 %v5781_v1 }
 0x1bf   : > { %5035 = vmatmul.mubr.msk.f32.vlgmr.msra.gmra.mxu0 %vm766_vm9, %v2181_v27  ;;  %5048 = vmatprep.subr.mxu0 %v5554_v4 }
 0x1c0   : > { %5049 = vmatpush3.msra.mxu0 %v5868_v6  ;;  %5056 = vmatprep.mubr.msk.f32.mxu0 %vm5555_vm0, %v5554_v4 }
 0x1c1   : > { %5050 = vmatprep.subr.mxu0 %v5554_v4 }
 0x1c2   : > { %5051 = vmatpush3.msra.mxu0 %v5875_v16 }
 0x1c3   : > { %5052 = vmatprep.subr.mxu0 %v5554_v4 }
 0x1c4   : > { %5053 = vmatpush3.msra.mxu0 %v5884_v17 }
 0x1c5   : > { %5054 = vmatprep.subr.mxu0 %v5554_v4 }
 0x1c6   : > { %5055 = vmatpush3.msra.mxu0 %v5891_v18 }
 0x1c7   : > { %5057 = vmatmul.mubr.msk.f32.vlgmr.msra.gmra.mxu0 %vm766_vm9, %v2181_v27  ;;  %5070 = vmatprep.subr.mxu0 %v5554_v4 }
 0x1c8   : > { %5071 = vmatpush3.msra.mxu0 %v5898_v19  ;;  %5078 = vmatprep.mubr.msk.f32.mxu0 %vm5555_vm0, %v5554_v4 }
 0x1c9   : > { %5072 = vmatprep.subr.mxu0 %v5554_v4 }
 0x1ca   : > { %5073 = vmatpush3.msra.mxu0 %v5907_v20 }
 0x1cb   : > { %5074 = vmatprep.subr.mxu0 %v5554_v4 }
 0x1cc   : > { %5075 = vmatpush3.msra.mxu0 %v5916_v21 }
 0x1cd   : > { %5076 = vmatprep.subr.mxu0 %v5554_v4 }
 0x1ce   : > { %5077 = vmatpush3.msra.mxu0 %v5923_v22 }
 0x1cf   : > { %5079 = vmatmul.mubr.msk.f32.vlgmr.msra.gmra.mxu0 %vm766_vm9, %v2181_v27  ;;  %5092 = vmatprep.subr.mxu0 %v5554_v4  ;;  %v6246_v27 = vld [vmem:[%s6659_s7 + $0x18] sm:$0xff] }
 0x1d0   : > { %5093 = vmatpush3.msra.mxu0 %v5752_v60  ;;  %5100 = vmatprep.mubr.msk.f32.mxu0 %vm5555_vm0, %v5554_v4 }
 0x1d1   : > { %5094 = vmatprep.subr.mxu0 %v5554_v4 }
 0x1d2   : > { %5095 = vmatpush3.msra.mxu0 %v5758_v62 }
 0x1d3   : > { %5096 = vmatprep.subr.mxu0 %v5554_v4 }
 0x1d4   : > { %5097 = vmatpush3.msra.mxu0 %v5767_v63 }
 0x1d5   : > { %5098 = vmatprep.subr.mxu0 %v5554_v4 }
 0x1d6   : > { %5099 = vmatpush3.msra.mxu0 %v5781_v1 }
 0x1d7   : > { %5101 = vmatmul.mubr.msk.f32.vlgmr.msra.gmra.mxu0 %vm766_vm9, %v2628_v30  ;;  %5114 = vmatprep.subr.mxu0 %v5554_v4 }
 0x1d8   : > { %5115 = vmatpush3.msra.mxu0 %v5868_v6  ;;  %5122 = vmatprep.mubr.msk.f32.mxu0 %vm5555_vm0, %v5554_v4 }
 0x1d9   : > { %5116 = vmatprep.subr.mxu0 %v5554_v4 }
 0x1da   : > { %5117 = vmatpush3.msra.mxu0 %v5875_v16 }
 0x1db   : > { %5118 = vmatprep.subr.mxu0 %v5554_v4 }
 0x1dc   : > { %5119 = vmatpush3.msra.mxu0 %v5884_v17 }
 0x1dd   : > { %5120 = vmatprep.subr.mxu0 %v5554_v4 }
 0x1de   : > { %5121 = vmatpush3.msra.mxu0 %v5891_v18 }
 0x1df   : > { %5123 = vmatmul.mubr.msk.f32.vlgmr.msra.gmra.mxu0 %vm766_vm9, %v2628_v30  ;;  %5136 = vmatprep.subr.mxu0 %v5554_v4 }
 0x1e0   : > { %5137 = vmatpush3.msra.mxu0 %v5898_v19  ;;  %5144 = vmatprep.mubr.msk.f32.mxu0 %vm5555_vm0, %v5554_v4 }
 0x1e1   : > { %5138 = vmatprep.subr.mxu0 %v5554_v4 }
 0x1e2   : > { %5139 = vmatpush3.msra.mxu0 %v5907_v20 }
 0x1e3   : > { %5140 = vmatprep.subr.mxu0 %v5554_v4 }
 0x1e4   : > { %5141 = vmatpush3.msra.mxu0 %v5916_v21 }
 0x1e5   : > { %5142 = vmatprep.subr.mxu0 %v5554_v4 }
 0x1e6   : > { %5143 = vmatpush3.msra.mxu0 %v5923_v22 }
 0x1e7   : > { %5145 = vmatmul.mubr.msk.f32.vlgmr.msra.gmra.mxu0 %vm766_vm9, %v2628_v30  ;;  %5158 = vmatprep.subr.mxu0 %v5554_v4  ;;  %v6264_v30 = vld [vmem:[%s6659_s7 + $0x8] sm:$0xff] }
 0x1e8   : > { %5159 = vmatpush3.msra.mxu0 %v5752_v60  ;;  %5166 = vmatprep.mubr.msk.f32.mxu0 %vm5555_vm0, %v5554_v4 }
 0x1e9   : > { %5160 = vmatprep.subr.mxu0 %v5554_v4 }
 0x1ea   : > { %5161 = vmatpush3.msra.mxu0 %v5758_v62 }
 0x1eb   : > { %5162 = vmatprep.subr.mxu0 %v5554_v4 }
 0x1ec   : > { %5163 = vmatpush3.msra.mxu0 %v5767_v63 }
 0x1ed   : > { %5164 = vmatprep.subr.mxu0 %v5554_v4 }
 0x1ee   : > { %5165 = vmatpush3.msra.mxu0 %v5781_v1 }
 0x1ef   : > { %5167 = vmatmul.mubr.msk.f32.vlgmr.msra.gmra.mxu0 %vm766_vm9, %v3075_v33  ;;  %5180 = vmatprep.subr.mxu0 %v5554_v4 }
 0x1f0   : > { %5181 = vmatpush3.msra.mxu0 %v5868_v6  ;;  %5188 = vmatprep.mubr.msk.f32.mxu0 %vm5555_vm0, %v5554_v4 }
 0x1f1   : > { %5182 = vmatprep.subr.mxu0 %v5554_v4 }
 0x1f2   : > { %5183 = vmatpush3.msra.mxu0 %v5875_v16 }
 0x1f3   : > { %5184 = vmatprep.subr.mxu0 %v5554_v4 }
 0x1f4   : > { %5185 = vmatpush3.msra.mxu0 %v5884_v17 }
 0x1f5   : > { %5186 = vmatprep.subr.mxu0 %v5554_v4 }
 0x1f6   : > { %5187 = vmatpush3.msra.mxu0 %v5891_v18 }
 0x1f7   : > { %5189 = vmatmul.mubr.msk.f32.vlgmr.msra.gmra.mxu0 %vm766_vm9, %v3075_v33  ;;  %5202 = vmatprep.subr.mxu0 %v5554_v4 }
 0x1f8   : > { %5203 = vmatpush3.msra.mxu0 %v5898_v19  ;;  %5210 = vmatprep.mubr.msk.f32.mxu0 %vm5555_vm0, %v5554_v4 }
 0x1f9   : > { %5204 = vmatprep.subr.mxu0 %v5554_v4 }
 0x1fa   : > { %5205 = vmatpush3.msra.mxu0 %v5907_v20 }
 0x1fb   : > { %5206 = vmatprep.subr.mxu0 %v5554_v4 }
 0x1fc   : > { %5207 = vmatpush3.msra.mxu0 %v5916_v21 }
 0x1fd   : > { %5208 = vmatprep.subr.mxu0 %v5554_v4 }
 0x1fe   : > { %5209 = vmatpush3.msra.mxu0 %v5923_v22 }
 0x1ff   : > { %5211 = vmatmul.mubr.msk.f32.vlgmr.msra.gmra.mxu0 %vm766_vm9, %v3075_v33  ;;  %5224 = vmatprep.subr.mxu0 %v5554_v4 }
 0x200   : > { %5225 = vmatpush3.msra.mxu0 %v5752_v60  ;;  %5232 = vmatprep.mubr.msk.f32.mxu0 %vm5555_vm0, %v5554_v4 }
 0x201   : > { %5226 = vmatprep.subr.mxu0 %v5554_v4 }
 0x202   : > { %5227 = vmatpush3.msra.mxu0 %v5758_v62 }
 0x203   : > { %5228 = vmatprep.subr.mxu0 %v5554_v4 }
 0x204   : > { %5229 = vmatpush3.msra.mxu0 %v5767_v63 }
 0x205   : > { %5230 = vmatprep.subr.mxu0 %v5554_v4 }
 0x206   : > { %5231 = vmatpush3.msra.mxu0 %v5781_v1 }
 0x207   : > { %5233 = vmatmul.mubr.msk.f32.vlgmr.msra.gmra.mxu0 %vm766_vm9, %v3522_v34  ;;  %5246 = vmatprep.subr.mxu0 %v5554_v4 }
 0x208   : > { %5247 = vmatpush3.msra.mxu0 %v5868_v6  ;;  %5254 = vmatprep.mubr.msk.f32.mxu0 %vm5555_vm0, %v5554_v4 }
 0x209   : > { %5248 = vmatprep.subr.mxu0 %v5554_v4 }
 0x20a   : > { %5249 = vmatpush3.msra.mxu0 %v5875_v16 }
 0x20b   : > { %5250 = vmatprep.subr.mxu0 %v5554_v4 }
 0x20c   : > { %5251 = vmatpush3.msra.mxu0 %v5884_v17 }
 0x20d   : > { %5252 = vmatprep.subr.mxu0 %v5554_v4 }
 0x20e   : > { %5253 = vmatpush3.msra.mxu0 %v5891_v18 }
 0x20f   : > { %5255 = vmatmul.mubr.msk.f32.vlgmr.msra.gmra.mxu0 %vm766_vm9, %v3522_v34  ;;  %5268 = vmatprep.subr.mxu0 %v5554_v4 }
 0x210   : > { %5269 = vmatpush3.msra.mxu0 %v5898_v19  ;;  %5276 = vmatprep.mubr.msk.f32.mxu0 %vm5555_vm0, %v5554_v4 }
 0x211   : > { %5270 = vmatprep.subr.mxu0 %v5554_v4 }
 0x212   : > { %5271 = vmatpush3.msra.mxu0 %v5907_v20 }
 0x213   : > { %5272 = vmatprep.subr.mxu0 %v5554_v4 }
 0x214   : > { %5273 = vmatpush3.msra.mxu0 %v5916_v21 }
 0x215   : > { %5274 = vmatprep.subr.mxu0 %v5554_v4 }
 0x216   : > { %5275 = vmatpush3.msra.mxu0 %v5923_v22 }
 0x217   : > { %5277 = vmatmul.mubr.msk.f32.vlgmr.msra.gmra.mxu0 %vm766_vm9, %v3522_v34  ;;  %5290 = vmatprep.subr.mxu0 %v5554_v4 }
 0x218   : > { %5291 = vmatpush3.msra.mxu0 %v5752_v60  ;;  %5298 = vmatprep.mubr.msk.f32.mxu0 %vm5555_vm0, %v5554_v4 }
 0x219   : > { %5292 = vmatprep.subr.mxu0 %v5554_v4 }
 0x21a   : > { %5293 = vmatpush3.msra.mxu0 %v5758_v62 }
 0x21b   : > { %5294 = vmatprep.subr.mxu0 %v5554_v4 }
 0x21c   : > { %5295 = vmatpush3.msra.mxu0 %v5767_v63 }
 0x21d   : > { %5296 = vmatprep.subr.mxu0 %v5554_v4 }
 0x21e   : > { %5297 = vmatpush3.msra.mxu0 %v5781_v1 }
 0x21f   : > { %5299 = vmatmul.mubr.msk.f32.vlgmr.msra.gmra.mxu0 %vm766_vm9, %v3969_v35  ;;  %5312 = vmatprep.subr.mxu0 %v5554_v4 }
 0x220   : > { %5313 = vmatpush3.msra.mxu0 %v5868_v6  ;;  %5320 = vmatprep.mubr.msk.f32.mxu0 %vm5555_vm0, %v5554_v4 }
 0x221   : > { %5314 = vmatprep.subr.mxu0 %v5554_v4 }
 0x222   : > { %5315 = vmatpush3.msra.mxu0 %v5875_v16 }
 0x223   : > { %5316 = vmatprep.subr.mxu0 %v5554_v4 }
 0x224   : > { %5317 = vmatpush3.msra.mxu0 %v5884_v17 }
 0x225   : > { %5318 = vmatprep.subr.mxu0 %v5554_v4 }
 0x226   : > { %5319 = vmatpush3.msra.mxu0 %v5891_v18 }
 0x227   : > { %5321 = vmatmul.mubr.msk.f32.vlgmr.msra.gmra.mxu0 %vm766_vm9, %v3969_v35  ;;  %5334 = vmatprep.subr.mxu0 %v5554_v4 }
 0x228   : > { %5335 = vmatpush3.msra.mxu0 %v5898_v19  ;;  %5342 = vmatprep.mubr.msk.f32.mxu0 %vm5555_vm0, %v5554_v4 }
 0x229   : > { %5336 = vmatprep.subr.mxu0 %v5554_v4 }
 0x22a   : > { %5337 = vmatpush3.msra.mxu0 %v5907_v20 }
 0x22b   : > { %5338 = vmatprep.subr.mxu0 %v5554_v4 }
 0x22c   : > { %5339 = vmatpush3.msra.mxu0 %v5916_v21 }
 0x22d   : > { %5340 = vmatprep.subr.mxu0 %v5554_v4 }
 0x22e   : > { %5341 = vmatpush3.msra.mxu0 %v5923_v22 }
 0x22f   : > { %5343 = vmatmul.mubr.msk.f32.vlgmr.msra.gmra.mxu0 %vm766_vm9, %v3969_v35 }
 0x237   : > { %v909_v37 = vpop.f32.mrf.mxu0 }
 0x238   : > { %v910_v38 = vadd.f32 %v909_v37, %v5999_v25 }
 0x239   : > { %v4838_v39 = vpop.f32.mrf.mxu0 }
 0x23a   : > { %v913_v40 = vadd.f32 %v910_v38, %v6177_v36 }
 0x23c   : > { %v4500_v41 = vmul.f32 -1.442695, %v913_v40 }
 0x23e   : > { %5399 = vpow2.f32 %v4500_v41 }
 0x23f   : > { %v1056_v43 = vpop.f32.mrf.mxu0 }
 0x240   : > { %v1057_v44 = vadd.f32 %v1056_v43, %v6016_v28  ;;  %v6255_v28 = vld [vmem:[%s6659_s7 + $0x10] sm:$0xff] }
 0x241   : > { %v4860_v45 = vpop.f32.mrf.mxu0 }
 0x242   : > { %v1060_v46 = vadd.f32 %v1057_v44, %v6184_v42 }
 0x244   : > { %v4502_v47 = vmul.f32 -1.442695, %v1060_v46 }
 0x246   : > { %5401 = vpow2.f32 %v4502_v47 }
 0x247   : > { %v1203_v48 = vpop.f32.mrf.mxu0 }
 0x248   : > { %v1204_v62 = vadd.f32 %v1203_v48, %v6202_v59 }
 0x249   : > { %v4882_v49 = vpop.f32.mrf.mxu0 }
 0x24b   : > { %v5400_v50 = vpop.eup %5399 }
 0x24c   : > { %v917_v51 = vadd.f32 1.0, %v5400_v50 }
 0x24e   : > { %5403 = vrcp.f32 %v917_v51 }
 0x24f   : > { %v6188_v52 = vpop.f32.mrf.mxu0 }
 0x251   : > { %v4904_v53 = vpop.f32.mrf.mxu0 }
 0x253   : > { %v5402_v54 = vpop.eup %5401 }
 0x254   : > { %v1064_v57 = vadd.f32 1.0, %v5402_v54 }
 0x256   : > { %5405 = vrcp.f32 %v1064_v57 }
 0x257   : > { %v6195_v56 = vpop.f32.mrf.mxu0 }
 0x259   : > { %v4926_v60 = vpop.f32.mrf.mxu0 }
 0x25b   : > { %v5404_v61 = vpop.eup %5403 }
 0x25c   : > { %v1207_v63 = vmul.f32 %v5404_v61, %v1134_v58 }
 0x25e   : > { %v1208_v1 = vadd.f32 %v1207_v63, %v1204_v62 }
 0x25f   : > { %v6205_v5 = vpop.f32.mrf.mxu0 }
 0x260   : > { %5407 = vtanh.f32 %v1208_v1 }
 0x261   : > { %v4948_v14 = vpop.f32.mrf.mxu0 }
 0x263   : > { %v5406_v6 = vpop.eup %5405 }
 0x264   : > { %v1210_v16 = vsub.f32 1.0, %v5406_v6  ;;  %v1212_v19 = vmul.f32 0.0, %v5406_v6 }
 0x267   : > { %v6207_v15 = vpop.f32.mrf.mxu0 }
 0x269   : > { %v4970_v7 = vpop.f32.mrf.mxu0 }
 0x26d   : > { %v5408_v17 = vpop.eup %5407 }
 0x26e   : > { %v1211_v18 = vmul.f32 %v5408_v17, %v1210_v16 }
 0x26f   : > { %v6209_v20 = vpop.f32.mrf.mxu0 }
 0x270   : > { %v6211_v21 = vadd.f32 %v1212_v19, %v1211_v18 }
 0x271   : > { %v4992_v22 = vpop.f32.mrf.mxu0 }
 0x272   : > { %4892 = vmatmul.mubr.msk.f32.vlgmr.msra.gmra.mxu1 %vm766_vm9, %v6211_v21 }
 0x273   : > { %4906 = vmatpush3.msra.mxu1 %v5790_v2  ;;  %4913 = vmatprep.mubr.msk.f32.mxu1 %vm5555_vm0, %v5554_v4 }
 0x274   : > { %4907 = vmatprep.subr.mxu1 %v5554_v4 }
 0x275   : > { %4908 = vmatpush3.msra.mxu1 %v5798_v3 }
 0x276   : > { %4909 = vmatprep.subr.mxu1 %v5554_v4 }
 0x277   : > { %4910 = vmatpush3.msra.mxu1 %v5807_v8  ;;  %v6222_v23 = vpop.f32.mrf.mxu0 }
 0x278   : > { %4911 = vmatprep.subr.mxu1 %v5554_v4 }
 0x279   : > { %4912 = vmatpush3.msra.mxu1 %v5814_v9  ;;  %v5014_v24 = vpop.f32.mrf.mxu0 }
 0x27a   : > { %4914 = vmatmul.mubr.msk.f32.vlgmr.msra.gmra.mxu1 %vm766_vm9, %v6211_v21  ;;  %4927 = vmatprep.subr.mxu1 %v5554_v4 }
 0x27b   : > { %4928 = vmatpush3.msra.mxu1 %v5824_v10  ;;  %4935 = vmatprep.mubr.msk.f32.mxu1 %vm5555_vm0, %v5554_v4 }
 0x27c   : > { %4929 = vmatprep.subr.mxu1 %v5554_v4 }
 0x27d   : > { %4930 = vmatpush3.msra.mxu1 %v5831_v11 }
 0x27e   : > { %4931 = vmatprep.subr.mxu1 %v5554_v4 }
 0x27f   : > { %4932 = vmatpush3.msra.mxu1 %v5838_v12  ;;  %v6236_v25 = vpop.f32.mrf.mxu0 }
 0x280   : > { %4933 = vmatprep.subr.mxu1 %v5554_v4 }
 0x281   : > { %4934 = vmatpush3.msra.mxu1 %v5845_v13  ;;  %v5036_v26 = vpop.f32.mrf.mxu0 }
 0x282   : > { %4936 = vmatmul.mubr.msk.f32.vlgmr.msra.gmra.mxu1 %vm766_vm9, %v6211_v21  ;;  %4949 = vmatprep.subr.mxu1 %v5554_v4 }
 0x283   : > { %4950 = vmatpush3.msra.mxu1 %v6246_v27  ;;  %4957 = vmatprep.mubr.msk.f32.mxu1 %vm5555_vm0, %v5554_v4 }
 0x284   : > { %4951 = vmatprep.subr.mxu1 %v5554_v4 }
 0x285   : > { %4952 = vmatpush3.msra.mxu1 %v6255_v28 }
 0x286   : > { %4953 = vmatprep.subr.mxu1 %v5554_v4 }
 0x287   : > { %v6259_v29 = vpop.f32.mrf.mxu0  ;;  %4954 = vmatpush3.msra.mxu1 %v6264_v30 }
 0x288   : > { %4955 = vmatprep.subr.mxu1 %v5554_v4 }
 0x289   : > { %v5058_v31 = vpop.f32.mrf.mxu0  ;;  %4956 = vmatpush3.msra.mxu1 %v5776_v0 }
 0x28a   : > { %4971 = vmatprep.subr.mxu1 %v5554_v4 }
 0x28f   : > { %v6270_v32 = vpop.f32.mrf.mxu0 }
 0x291   : > { %v5080_v33 = vpop.f32.mrf.mxu0 }
 0x297   : > { %v6272_v34 = vpop.f32.mrf.mxu0 }
 0x299   : > { %v5102_v35 = vpop.f32.mrf.mxu0 }
 0x29f   : > { %v6274_v37 = vpop.f32.mrf.mxu0 }
 0x2a1   : > { %v5124_v38 = vpop.f32.mrf.mxu0 }
 0x2a7   : > { %v6276_v39 = vpop.f32.mrf.mxu0 }
 0x2a9   : > { %v5146_v40 = vpop.f32.mrf.mxu0 }
 0x2af   : > { %v6278_v41 = vpop.f32.mrf.mxu0 }
 0x2b1   : > { %v5168_v43 = vpop.f32.mrf.mxu0 }
 0x2b7   : > { %v6280_v44 = vpop.f32.mrf.mxu0 }
 0x2b9   : > { %v5190_v45 = vpop.f32.mrf.mxu0 }
 0x2ba   : > { %v1651_v45 = vadd.f32 %v6205_v5, %v6202_v59 }
 0x2bf   : > { %v6282_v46 = vpop.f32.mrf.mxu0 }
 0x2c1   : > { %v5212_v47 = vpop.f32.mrf.mxu0 }
 0x2c7   : > { %v6284_v48 = vpop.f32.mrf.mxu0 }
 0x2c9   : > { %v5234_v49 = vpop.f32.mrf.mxu0 }
 0x2cf   : > { %v6286_v50 = vpop.f32.mrf.mxu0 }
 0x2d1   : > { %v5256_v51 = vpop.f32.mrf.mxu0 }
 0x2d7   : > { %v6288_v53 = vpop.f32.mrf.mxu0 }
 0x2d9   : > { %v5278_v54 = vpop.f32.mrf.mxu0 }
 0x2df   : > { %v6290_v57 = vpop.f32.mrf.mxu0 }
 0x2e1   : > { %v5300_v58 = vpop.f32.mrf.mxu0 }
 0x2e7   : > { %v6292_v60 = vpop.f32.mrf.mxu0 }
 0x2e9   : > { %v5322_v61 = vpop.f32.mrf.mxu0 }
 0x2ef   : > { %v6294_v62 = vpop.f32.mrf.mxu0 }
 0x2f1   : > { %v5344_v63 = vpop.f32.mrf.mxu0 }
 0x332   : > { %v1283_v1 = vpop.f32.mrf.mxu1 }
 0x333   : > { %v1357_v14 = vadd.f32 %v6188_v52, %v1283_v1 }
 0x334   : > { %v4893_v6 = vpop.f32.mrf.mxu1 }
 0x335   : > { %v1360_v7 = vadd.f32 %v1357_v14, %v6177_v36 }
 0x337   : > { %v4506_v16 = vmul.f32 -1.442695, %v1360_v7 }
 0x339   : > { %5409 = vpow2.f32 %v4506_v16 }
 0x33a   : > { %v1433_v17 = vpop.f32.mrf.mxu1 }
 0x33b   : > { %v1504_v18 = vadd.f32 %v6195_v56, %v1433_v17 }
 0x33c   : > { %v4915_v19 = vpop.f32.mrf.mxu1 }
 0x33d   : > { %v1507_v22 = vadd.f32 %v1504_v18, %v6184_v42 }
 0x33f   : > { %v4509_v24 = vmul.f32 -1.442695, %v1507_v22 }
 0x341   : > { %5411 = vpow2.f32 %v4509_v24 }
 0x342   : > { %v1580_v26 = vpop.f32.mrf.mxu1 }
 0x343   : > { %v1581_v40 = vadd.f32 %v1580_v26, %v6193_v55 }
 0x344   : > { %v4937_v31 = vpop.f32.mrf.mxu1 }
 0x346   : > { %v5410_v33 = vpop.eup %5409 }
 0x347   : > { %v1364_v35 = vadd.f32 1.0, %v5410_v33 }
 0x349   : > { %5413 = vrcp.f32 %v1364_v35 }
 0x34e   : > { %v5412_v38 = vpop.eup %5411 }
 0x34f   : > { %v1511_v52 = vadd.f32 1.0, %v5412_v38  ;;  %v2098_v38 = vadd.f32 %v6222_v23, %v6202_v59 }
 0x351   : > { %5415 = vrcp.f32 %v1511_v52 }
 0x356   : > { %v5414_v43 = vpop.eup %5413 }
 0x357   : > { %v1654_v56 = vmul.f32 %v5414_v43, %v1581_v40 }
 0x359   : > { %v1655_v47 = vadd.f32 %v1654_v56, %v1651_v45 }
 0x35b   : > { %5417 = vtanh.f32 %v1655_v47 }
 0x35e   : > { %v5416_v49 = vpop.eup %5415 }
 0x35f   : > { %v1657_v51 = vsub.f32 1.0, %v5416_v49  ;;  %v1659_v61 = vmul.f32 %v5416_v49, %v6211_v21 }
 0x368   : > { %v5418_v54 = vpop.eup %5417 }
 0x369   : > { %v1658_v58 = vmul.f32 %v5418_v54, %v1657_v51 }
 0x36b   : > { %v1660_v63 = vadd.f32 %v1659_v61, %v1658_v58 }
 0x36d   : > { %4958 = vmatmul.mubr.msk.f32.vlgmr.msra.gmra.mxu1 %vm766_vm9, %v1660_v63 }
 0x36e   : > { %4972 = vmatpush3.msra.mxu1 %v5790_v2  ;;  %4979 = vmatprep.mubr.msk.f32.mxu1 %vm5555_vm0, %v5554_v4 }
 0x36f   : > { %4973 = vmatprep.subr.mxu1 %v5554_v4 }
 0x370   : > { %4974 = vmatpush3.msra.mxu1 %v5798_v3 }
 0x371   : > { %4975 = vmatprep.subr.mxu1 %v5554_v4 }
 0x372   : > { %4976 = vmatpush3.msra.mxu1 %v5807_v8 }
 0x373   : > { %4977 = vmatprep.subr.mxu1 %v5554_v4 }
 0x374   : > { %4978 = vmatpush3.msra.mxu1 %v5814_v9 }
 0x375   : > { %4980 = vmatmul.mubr.msk.f32.vlgmr.msra.gmra.mxu1 %vm766_vm9, %v1660_v63  ;;  %4993 = vmatprep.subr.mxu1 %v5554_v4 }
 0x376   : > { %4994 = vmatpush3.msra.mxu1 %v5824_v10  ;;  %5001 = vmatprep.mubr.msk.f32.mxu1 %vm5555_vm0, %v5554_v4 }
 0x377   : > { %4995 = vmatprep.subr.mxu1 %v5554_v4 }
 0x378   : > { %4996 = vmatpush3.msra.mxu1 %v5831_v11 }
 0x379   : > { %4997 = vmatprep.subr.mxu1 %v5554_v4 }
 0x37a   : > { %4998 = vmatpush3.msra.mxu1 %v5838_v12 }
 0x37b   : > { %4999 = vmatprep.subr.mxu1 %v5554_v4 }
 0x37c   : > { %5000 = vmatpush3.msra.mxu1 %v5845_v13 }
 0x37d   : > { %5002 = vmatmul.mubr.msk.f32.vlgmr.msra.gmra.mxu1 %vm766_vm9, %v1660_v63  ;;  %5015 = vmatprep.subr.mxu1 %v5554_v4 }
 0x37e   : > { %5016 = vmatpush3.msra.mxu1 %v6246_v27  ;;  %5023 = vmatprep.mubr.msk.f32.mxu1 %vm5555_vm0, %v5554_v4 }
 0x37f   : > { %5017 = vmatprep.subr.mxu1 %v5554_v4 }
 0x380   : > { %5018 = vmatpush3.msra.mxu1 %v6255_v28 }
 0x381   : > { %5019 = vmatprep.subr.mxu1 %v5554_v4 }
 0x382   : > { %5020 = vmatpush3.msra.mxu1 %v6264_v30 }
 0x383   : > { %5021 = vmatprep.subr.mxu1 %v5554_v4 }
 0x384   : > { %5022 = vmatpush3.msra.mxu1 %v5776_v0 }
 0x385   : > { %5037 = vmatprep.subr.mxu1 %v5554_v4 }
 0x42d   : > { %v1730_v5 = vpop.f32.mrf.mxu1 }
 0x42e   : > { %v1804_v21 = vadd.f32 %v6207_v15, %v1730_v5 }
 0x42f   : > { %v4959_v1 = vpop.f32.mrf.mxu1 }
 0x430   : > { %v1807_v14 = vadd.f32 %v1804_v21, %v6177_v36 }
 0x432   : > { %v4514_v6 = vmul.f32 -1.442695, %v1807_v14 }
 0x434   : > { %5419 = vpow2.f32 %v4514_v6  ;;  %v2545_v6 = vadd.f32 %v6270_v32, %v6202_v59  ;;  %v6405_v32 = vld [vmem:[%s6660_s8 + $0x10] sm:$0xff] }
 0x435   : > { %v1880_v7 = vpop.f32.mrf.mxu1 }
 0x436   : > { %v1951_v16 = vadd.f32 %v6209_v20, %v1880_v7 }
 0x437   : > { %v4981_v17 = vpop.f32.mrf.mxu1 }
 0x438   : > { %v1954_v18 = vadd.f32 %v1951_v16, %v6184_v42 }
 0x43a   : > { %v4517_v19 = vmul.f32 -1.442695, %v1954_v18 }
 0x43c   : > { %5421 = vpow2.f32 %v4517_v19 }
 0x43d   : > { %v2027_v22 = vpop.f32.mrf.mxu1 }
 0x43e   : > { %v2028_v33 = vadd.f32 %v2027_v22, %v6193_v55 }
 0x43f   : > { %v5003_v0 = vpop.f32.mrf.mxu1 }
 0x441   : > { %v5420_v24 = vpop.eup %5419 }
 0x442   : > { %v1811_v26 = vadd.f32 1.0, %v5420_v24  ;;  %v6396_v24 = vld [vmem:[%s6660_s8 + $0x18] sm:$0xff] }
 0x444   : > { %5423 = vrcp.f32 %v1811_v26  ;;  %v6412_v26 = vld [vmem:[%s6660_s8 + $0x8] sm:$0xff] }
 0x449   : > { %v5422_v31 = vpop.eup %5421 }
 0x44a   : > { %v1958_v15 = vadd.f32 1.0, %v5422_v31  ;;  %v6419_v31 = vld [vmem:[%s6660_s8] sm:$0xff] }
 0x44c   : > { %5425 = vrcp.f32 %v1958_v15  ;;  %v6428_v15 = vld [vmem:[%s6661_s9 + $0x18] sm:$0xff] }
 0x451   : > { %v5424_v35 = vpop.eup %5423 }
 0x452   : > { %v2101_v20 = vmul.f32 %v5424_v35, %v2028_v33  ;;  %v6437_v33 = vld [vmem:[%s6661_s9 + $0x10] sm:$0xff]  ;;  %v6444_v35 = vld [vmem:[%s6661_s9 + $0x8] sm:$0xff] }
 0x454   : > { %v2102_v52 = vadd.f32 %v2101_v20, %v2098_v38  ;;  %v6451_v38 = vld [vmem:[%s6661_s9] sm:$0xff] }
 0x456   : > { %5427 = vtanh.f32 %v2102_v52 }
 0x459   : > { %v5426_v40 = vpop.eup %5425 }
 0x45a   : > { %v2104_v43 = vsub.f32 1.0, %v5426_v40  ;;  %v2106_v47 = vmul.f32 %v5426_v40, %v1660_v63 }
 0x463   : > { %v5428_v45 = vpop.eup %5427 }
 0x464   : > { %v2105_v56 = vmul.f32 %v5428_v45, %v2104_v43 }
 0x466   : > { %v2107_v49 = vadd.f32 %v2106_v47, %v2105_v56 }
 0x468   : > { %5024 = vmatmul.mubr.msk.f32.vlgmr.msra.gmra.mxu1 %vm766_vm9, %v2107_v49 }
 0x469   : > { %5038 = vmatpush3.msra.mxu1 %v5790_v2  ;;  %5045 = vmatprep.mubr.msk.f32.mxu1 %vm5555_vm0, %v5554_v4  ;;  %v6378_v2 = vld [vmem:[%s6659_s7] sm:$0xff] }
 0x46a   : > { %5039 = vmatprep.subr.mxu1 %v5554_v4 }
 0x46b   : > { %5040 = vmatpush3.msra.mxu1 %v5798_v3 }
 0x46c   : > { %5041 = vmatprep.subr.mxu1 %v5554_v4 }
 0x46d   : > { %5042 = vmatpush3.msra.mxu1 %v5807_v8 }
 0x46e   : > { %5043 = vmatprep.subr.mxu1 %v5554_v4 }
 0x46f   : > { %5044 = vmatpush3.msra.mxu1 %v5814_v9 }
 0x470   : > { %5046 = vmatmul.mubr.msk.f32.vlgmr.msra.gmra.mxu1 %vm766_vm9, %v2107_v49  ;;  %5059 = vmatprep.subr.mxu1 %v5554_v4 }
 0x471   : > { %5060 = vmatpush3.msra.mxu1 %v5824_v10  ;;  %5067 = vmatprep.mubr.msk.f32.mxu1 %vm5555_vm0, %v5554_v4 }
 0x472   : > { %5061 = vmatprep.subr.mxu1 %v5554_v4 }
 0x473   : > { %5062 = vmatpush3.msra.mxu1 %v5831_v11 }
 0x474   : > { %5063 = vmatprep.subr.mxu1 %v5554_v4 }
 0x475   : > { %5064 = vmatpush3.msra.mxu1 %v5838_v12 }
 0x476   : > { %5065 = vmatprep.subr.mxu1 %v5554_v4 }
 0x477   : > { %5066 = vmatpush3.msra.mxu1 %v5845_v13 }
 0x478   : > { %5068 = vmatmul.mubr.msk.f32.vlgmr.msra.gmra.mxu1 %vm766_vm9, %v2107_v49  ;;  %5081 = vmatprep.subr.mxu1 %v5554_v4 }
 0x479   : > { %5082 = vmatpush3.msra.mxu1 %v6246_v27  ;;  %5089 = vmatprep.mubr.msk.f32.mxu1 %vm5555_vm0, %v5554_v4 }
 0x47a   : > { %5083 = vmatprep.subr.mxu1 %v5554_v4 }
 0x47b   : > { %5084 = vmatpush3.msra.mxu1 %v6255_v28 }
 0x47c   : > { %5085 = vmatprep.subr.mxu1 %v5554_v4 }
 0x47d   : > { %5086 = vmatpush3.msra.mxu1 %v6264_v30 }
 0x47e   : > { %5087 = vmatprep.subr.mxu1 %v5554_v4 }
 0x47f   : > { %5088 = vmatpush3.msra.mxu1 %v6378_v2 }
 0x480   : > { %5103 = vmatprep.subr.mxu1 %v5554_v4 }
 0x528   : > { %v2177_v3 = vpop.f32.mrf.mxu1 }
 0x529   : > { %v2251_v8 = vadd.f32 %v6236_v25, %v2177_v3 }
 0x52a   : > { %v5025_v9 = vpop.f32.mrf.mxu1 }
 0x52b   : > { %v2254_v10 = vadd.f32 %v2251_v8, %v6177_v36 }
 0x52d   : > { %v4522_v11 = vmul.f32 -1.442695, %v2254_v10 }
 0x52f   : > { %5429 = vpow2.f32 %v4522_v11 }
 0x530   : > { %v2327_v12 = vpop.f32.mrf.mxu1 }
 0x531   : > { %v2398_v13 = vadd.f32 %v6259_v29, %v2327_v12 }
 0x532   : > { %v5047_v23 = vpop.f32.mrf.mxu1 }
 0x533   : > { %v2401_v51 = vadd.f32 %v2398_v13, %v6184_v42 }
 0x535   : > { %v4525_v54 = vmul.f32 -1.442695, %v2401_v51 }
 0x537   : > { %5431 = vpow2.f32 %v4525_v54  ;;  %v2992_v54 = vadd.f32 %v6276_v39, %v6202_v59 }
 0x538   : > { %v2474_v58 = vpop.f32.mrf.mxu1 }
 0x539   : > { %v2475_v1 = vadd.f32 %v2474_v58, %v6193_v55 }
 0x53a   : > { %v5069_v61 = vpop.f32.mrf.mxu1 }
 0x53c   : > { %v5430_v63 = vpop.eup %5429 }
 0x53d   : > { %v2258_v5 = vadd.f32 1.0, %v5430_v63 }
 0x53f   : > { %5433 = vrcp.f32 %v2258_v5 }
 0x544   : > { %v5432_v21 = vpop.eup %5431 }
 0x545   : > { %v2405_v25 = vadd.f32 1.0, %v5432_v21 }
 0x547   : > { %5435 = vrcp.f32 %v2405_v25 }
 0x54c   : > { %v5434_v14 = vpop.eup %5433 }
 0x54d   : > { %v2548_v29 = vmul.f32 %v5434_v14, %v2475_v1 }
 0x54f   : > { %v2549_v7 = vadd.f32 %v2548_v29, %v2545_v6 }
 0x551   : > { %5437 = vtanh.f32 %v2549_v7 }
 0x554   : > { %v5436_v16 = vpop.eup %5435 }
 0x555   : > { %v2551_v17 = vsub.f32 1.0, %v5436_v16  ;;  %v2553_v22 = vmul.f32 %v5436_v16, %v2107_v49 }
 0x55e   : > { %v5438_v18 = vpop.eup %5437 }
 0x55f   : > { %v2552_v19 = vmul.f32 %v5438_v18, %v2551_v17 }
 0x561   : > { %v6389_v0 = vadd.f32 %v2553_v22, %v2552_v19 }
 0x563   : > { %5090 = vmatmul.mubr.msk.f32.vlgmr.msra.gmra.mxu1 %vm766_vm9, %v6389_v0 }
 0x564   : > { %5104 = vmatpush3.msra.mxu1 %v6396_v24  ;;  %5111 = vmatprep.mubr.msk.f32.mxu1 %vm5555_vm0, %v5554_v4 }
 0x565   : > { %5105 = vmatprep.subr.mxu1 %v5554_v4 }
 0x566   : > { %5106 = vmatpush3.msra.mxu1 %v6405_v32 }
 0x567   : > { %5107 = vmatprep.subr.mxu1 %v5554_v4 }
 0x568   : > { %5108 = vmatpush3.msra.mxu1 %v6412_v26 }
 0x569   : > { %5109 = vmatprep.subr.mxu1 %v5554_v4 }
 0x56a   : > { %5110 = vmatpush3.msra.mxu1 %v6419_v31 }
 0x56b   : > { %5112 = vmatmul.mubr.msk.f32.vlgmr.msra.gmra.mxu1 %vm766_vm9, %v6389_v0  ;;  %5125 = vmatprep.subr.mxu1 %v5554_v4 }
 0x56c   : > { %5126 = vmatpush3.msra.mxu1 %v6428_v15  ;;  %5133 = vmatprep.mubr.msk.f32.mxu1 %vm5555_vm0, %v5554_v4 }
 0x56d   : > { %5127 = vmatprep.subr.mxu1 %v5554_v4 }
 0x56e   : > { %5128 = vmatpush3.msra.mxu1 %v6437_v33 }
 0x56f   : > { %5129 = vmatprep.subr.mxu1 %v5554_v4 }
 0x570   : > { %5130 = vmatpush3.msra.mxu1 %v6444_v35 }
 0x571   : > { %5131 = vmatprep.subr.mxu1 %v5554_v4 }
 0x572   : > { %5132 = vmatpush3.msra.mxu1 %v6451_v38 }
 0x573   : > { %5134 = vmatmul.mubr.msk.f32.vlgmr.msra.gmra.mxu1 %vm766_vm9, %v6389_v0  ;;  %5147 = vmatprep.subr.mxu1 %v5554_v4 }
 0x574   : > { %5148 = vmatpush3.msra.mxu1 %v6246_v27  ;;  %5155 = vmatprep.mubr.msk.f32.mxu1 %vm5555_vm0, %v5554_v4 }
 0x575   : > { %5149 = vmatprep.subr.mxu1 %v5554_v4 }
 0x576   : > { %5150 = vmatpush3.msra.mxu1 %v6255_v28 }
 0x577   : > { %5151 = vmatprep.subr.mxu1 %v5554_v4 }
 0x578   : > { %5152 = vmatpush3.msra.mxu1 %v6264_v30 }
 0x579   : > { %5153 = vmatprep.subr.mxu1 %v5554_v4 }
 0x57a   : > { %5154 = vmatpush3.msra.mxu1 %v6378_v2 }
 0x57b   : > { %5169 = vmatprep.subr.mxu1 %v5554_v4 }
 0x623   : > { %v2624_v20 = vpop.f32.mrf.mxu1 }
 0x624   : > { %v2698_v52 = vadd.f32 %v6272_v34, %v2624_v20 }
 0x625   : > { %v5091_v40 = vpop.f32.mrf.mxu1 }
 0x626   : > { %v2701_v43 = vadd.f32 %v2698_v52, %v6177_v36 }
 0x628   : > { %v4530_v45 = vmul.f32 -1.442695, %v2701_v43 }
 0x62a   : > { %5439 = vpow2.f32 %v4530_v45 }
 0x62b   : > { %v2774_v56 = vpop.f32.mrf.mxu1 }
 0x62c   : > { %v2845_v47 = vadd.f32 %v6274_v37, %v2774_v56 }
 0x62d   : > { %v5113_v49 = vpop.f32.mrf.mxu1 }
 0x62e   : > { %v2848_v3 = vadd.f32 %v2845_v47, %v6184_v42  ;;  %v3439_v47 = vadd.f32 %v6282_v46, %v6202_v59 }
 0x630   : > { %v4533_v8 = vmul.f32 -1.442695, %v2848_v3 }
 0x632   : > { %5441 = vpow2.f32 %v4533_v8 }
 0x633   : > { %v2921_v9 = vpop.f32.mrf.mxu1 }
 0x634   : > { %v2922_v23 = vadd.f32 %v2921_v9, %v6193_v55 }
 0x635   : > { %v5135_v10 = vpop.f32.mrf.mxu1 }
 0x637   : > { %v5440_v11 = vpop.eup %5439 }
 0x638   : > { %v2705_v12 = vadd.f32 1.0, %v5440_v11 }
 0x63a   : > { %5443 = vrcp.f32 %v2705_v12 }
 0x63f   : > { %v5442_v13 = vpop.eup %5441 }
 0x640   : > { %v2852_v34 = vadd.f32 1.0, %v5442_v13 }
 0x642   : > { %5445 = vrcp.f32 %v2852_v34 }
 0x647   : > { %v5444_v51 = vpop.eup %5443 }
 0x648   : > { %v2995_v37 = vmul.f32 %v5444_v51, %v2922_v23 }
 0x64a   : > { %v2996_v58 = vadd.f32 %v2995_v37, %v2992_v54 }
 0x64c   : > { %5447 = vtanh.f32 %v2996_v58 }
 0x64f   : > { %v5446_v61 = vpop.eup %5445 }
 0x650   : > { %v2998_v63 = vsub.f32 1.0, %v5446_v61  ;;  %v3000_v25 = vmul.f32 %v5446_v61, %v6389_v0 }
 0x659   : > { %v5448_v5 = vpop.eup %5447 }
 0x65a   : > { %v2999_v21 = vmul.f32 %v5448_v5, %v2998_v63 }
 0x65c   : > { %v3001_v1 = vadd.f32 %v3000_v25, %v2999_v21 }
 0x65e   : > { %5156 = vmatmul.mubr.msk.f32.vlgmr.msra.gmra.mxu1 %vm766_vm9, %v3001_v1 }
 0x65f   : > { %5170 = vmatpush3.msra.mxu1 %v6396_v24  ;;  %5177 = vmatprep.mubr.msk.f32.mxu1 %vm5555_vm0, %v5554_v4 }
 0x660   : > { %5171 = vmatprep.subr.mxu1 %v5554_v4 }
 0x661   : > { %5172 = vmatpush3.msra.mxu1 %v6405_v32 }
 0x662   : > { %5173 = vmatprep.subr.mxu1 %v5554_v4 }
 0x663   : > { %5174 = vmatpush3.msra.mxu1 %v6412_v26 }
 0x664   : > { %5175 = vmatprep.subr.mxu1 %v5554_v4 }
 0x665   : > { %5176 = vmatpush3.msra.mxu1 %v6419_v31 }
 0x666   : > { %5178 = vmatmul.mubr.msk.f32.vlgmr.msra.gmra.mxu1 %vm766_vm9, %v3001_v1  ;;  %5191 = vmatprep.subr.mxu1 %v5554_v4 }
 0x667   : > { %5192 = vmatpush3.msra.mxu1 %v6428_v15  ;;  %5199 = vmatprep.mubr.msk.f32.mxu1 %vm5555_vm0, %v5554_v4 }
 0x668   : > { %5193 = vmatprep.subr.mxu1 %v5554_v4 }
 0x669   : > { %5194 = vmatpush3.msra.mxu1 %v6437_v33 }
 0x66a   : > { %5195 = vmatprep.subr.mxu1 %v5554_v4 }
 0x66b   : > { %5196 = vmatpush3.msra.mxu1 %v6444_v35 }
 0x66c   : > { %5197 = vmatprep.subr.mxu1 %v5554_v4 }
 0x66d   : > { %5198 = vmatpush3.msra.mxu1 %v6451_v38 }
 0x66e   : > { %5200 = vmatmul.mubr.msk.f32.vlgmr.msra.gmra.mxu1 %vm766_vm9, %v3001_v1  ;;  %5213 = vmatprep.subr.mxu1 %v5554_v4 }
 0x66f   : > { %5214 = vmatpush3.msra.mxu1 %v6246_v27  ;;  %5221 = vmatprep.mubr.msk.f32.mxu1 %vm5555_vm0, %v5554_v4 }
 0x670   : > { %5215 = vmatprep.subr.mxu1 %v5554_v4 }
 0x671   : > { %5216 = vmatpush3.msra.mxu1 %v6255_v28 }
 0x672   : > { %5217 = vmatprep.subr.mxu1 %v5554_v4 }
 0x673   : > { %5218 = vmatpush3.msra.mxu1 %v6264_v30 }
 0x674   : > { %5219 = vmatprep.subr.mxu1 %v5554_v4 }
 0x675   : > { %5220 = vmatpush3.msra.mxu1 %v6378_v2 }
 0x676   : > { %5235 = vmatprep.subr.mxu1 %v5554_v4 }
 0x71e   : > { %v3071_v39 = vpop.f32.mrf.mxu1 }
 0x71f   : > { %v3145_v14 = vadd.f32 %v6278_v41, %v3071_v39 }
 0x720   : > { %v5157_v6 = vpop.f32.mrf.mxu1 }
 0x721   : > { %v3148_v29 = vadd.f32 %v3145_v14, %v6177_v36 }
 0x723   : > { %v4538_v7 = vmul.f32 -1.442695, %v3148_v29 }
 0x725   : > { %5449 = vpow2.f32 %v4538_v7 }
 0x726   : > { %v3221_v16 = vpop.f32.mrf.mxu1 }
 0x727   : > { %v3292_v17 = vadd.f32 %v6280_v44, %v3221_v16 }
 0x728   : > { %v5179_v18 = vpop.f32.mrf.mxu1 }
 0x729   : > { %v3295_v19 = vadd.f32 %v3292_v17, %v6184_v42 }
 0x72b   : > { %v4541_v22 = vmul.f32 -1.442695, %v3295_v19 }
 0x72d   : > { %5451 = vpow2.f32 %v4541_v22 }
 0x72e   : > { %v3368_v0 = vpop.f32.mrf.mxu1 }
 0x72f   : > { %v3369_v45 = vadd.f32 %v3368_v0, %v6193_v55 }
 0x730   : > { %v5201_v20 = vpop.f32.mrf.mxu1 }
 0x732   : > { %v5450_v52 = vpop.eup %5449 }
 0x733   : > { %v3152_v40 = vadd.f32 1.0, %v5450_v52 }
 0x735   : > { %5453 = vrcp.f32 %v3152_v40 }
 0x73a   : > { %v5452_v43 = vpop.eup %5451 }
 0x73b   : > { %v3299_v41 = vadd.f32 1.0, %v5452_v43 }
 0x73d   : > { %5455 = vrcp.f32 %v3299_v41 }
 0x742   : > { %v5454_v56 = vpop.eup %5453 }
 0x743   : > { %v3442_v44 = vmul.f32 %v5454_v56, %v3369_v45 }
 0x745   : > { %v3443_v49 = vadd.f32 %v3442_v44, %v3439_v47 }
 0x747   : > { %5457 = vtanh.f32 %v3443_v49 }
 0x74a   : > { %v5456_v3 = vpop.eup %5455 }
 0x74b   : > { %v3445_v8 = vsub.f32 1.0, %v5456_v3  ;;  %v3447_v11 = vmul.f32 %v5456_v3, %v3001_v1  ;;  %v3886_v1 = vadd.f32 %v6288_v53, %v6202_v59  ;;  %v4346_v53 = vld [vmem:[%s6666_s14 + $0x18] sm:$0xff] }
 0x754   : > { %v5458_v9 = vpop.eup %5457 }
 0x755   : > { %v3446_v10 = vmul.f32 %v5458_v9, %v3445_v8 }
 0x757   : > { %v3448_v12 = vadd.f32 %v3447_v11, %v3446_v10 }
 0x759   : > { %5222 = vmatmul.mubr.msk.f32.vlgmr.msra.gmra.mxu1 %vm766_vm9, %v3448_v12 }
 0x75a   : > { %5236 = vmatpush3.msra.mxu1 %v6396_v24  ;;  %5243 = vmatprep.mubr.msk.f32.mxu1 %vm5555_vm0, %v5554_v4 }
 0x75b   : > { %5237 = vmatprep.subr.mxu1 %v5554_v4 }
 0x75c   : > { %5238 = vmatpush3.msra.mxu1 %v6405_v32 }
 0x75d   : > { %5239 = vmatprep.subr.mxu1 %v5554_v4 }
 0x75e   : > { %5240 = vmatpush3.msra.mxu1 %v6412_v26 }
 0x75f   : > { %5241 = vmatprep.subr.mxu1 %v5554_v4 }
 0x760   : > { %5242 = vmatpush3.msra.mxu1 %v6419_v31 }
 0x761   : > { %5244 = vmatmul.mubr.msk.f32.vlgmr.msra.gmra.mxu1 %vm766_vm9, %v3448_v12  ;;  %5257 = vmatprep.subr.mxu1 %v5554_v4 }
 0x762   : > { %5258 = vmatpush3.msra.mxu1 %v6428_v15  ;;  %5265 = vmatprep.mubr.msk.f32.mxu1 %vm5555_vm0, %v5554_v4 }
 0x763   : > { %5259 = vmatprep.subr.mxu1 %v5554_v4 }
 0x764   : > { %5260 = vmatpush3.msra.mxu1 %v6437_v33 }
 0x765   : > { %5261 = vmatprep.subr.mxu1 %v5554_v4 }
 0x766   : > { %5262 = vmatpush3.msra.mxu1 %v6444_v35 }
 0x767   : > { %5263 = vmatprep.subr.mxu1 %v5554_v4 }
 0x768   : > { %5264 = vmatpush3.msra.mxu1 %v6451_v38 }
 0x769   : > { %5266 = vmatmul.mubr.msk.f32.vlgmr.msra.gmra.mxu1 %vm766_vm9, %v3448_v12  ;;  %5279 = vmatprep.subr.mxu1 %v5554_v4 }
 0x76a   : > { %5280 = vmatpush3.msra.mxu1 %v6246_v27  ;;  %5287 = vmatprep.mubr.msk.f32.mxu1 %vm5555_vm0, %v5554_v4 }
 0x76b   : > { %5281 = vmatprep.subr.mxu1 %v5554_v4 }
 0x76c   : > { %5282 = vmatpush3.msra.mxu1 %v6255_v28 }
 0x76d   : > { %5283 = vmatprep.subr.mxu1 %v5554_v4 }
 0x76e   : > { %5284 = vmatpush3.msra.mxu1 %v6264_v30 }
 0x76f   : > { %5285 = vmatprep.subr.mxu1 %v5554_v4 }
 0x770   : > { %5286 = vmatpush3.msra.mxu1 %v6378_v2 }
 0x771   : > { %5301 = vmatprep.subr.mxu1 %v5554_v4 }
 0x819   : > { %v3518_v46 = vpop.f32.mrf.mxu1 }
 0x81a   : > { %v3592_v27 = vadd.f32 %v6284_v48, %v3518_v46 }
 0x81b   : > { %v5223_v13 = vpop.f32.mrf.mxu1 }
 0x81c   : > { %v3595_v34 = vadd.f32 %v3592_v27, %v6177_v36 }
 0x81e   : > { %v4546_v23 = vmul.f32 -1.442695, %v3595_v34 }
 0x820   : > { %5459 = vpow2.f32 %v4546_v23 }
 0x821   : > { %v3668_v51 = vpop.f32.mrf.mxu1 }
 0x822   : > { %v3739_v28 = vadd.f32 %v6286_v50, %v3668_v51 }
 0x823   : > { %v5245_v54 = vpop.f32.mrf.mxu1 }
 0x824   : > { %v3742_v30 = vadd.f32 %v3739_v28, %v6184_v42 }
 0x826   : > { %v4549_v37 = vmul.f32 -1.442695, %v3742_v30 }
 0x828   : > { %5461 = vpow2.f32 %v4549_v37 }
 0x829   : > { %v3815_v58 = vpop.f32.mrf.mxu1 }
 0x82a   : > { %v3816_v21 = vadd.f32 %v3815_v58, %v6193_v55 }
 0x82b   : > { %v5267_v2 = vpop.f32.mrf.mxu1 }
 0x82d   : > { %v5460_v61 = vpop.eup %5459 }
 0x82e   : > { %v3599_v63 = vadd.f32 1.0, %v5460_v61 }
 0x830   : > { %5463 = vrcp.f32 %v3599_v63 }
 0x835   : > { %v5462_v5 = vpop.eup %5461 }
 0x836   : > { %v3746_v48 = vadd.f32 1.0, %v5462_v5 }
 0x838   : > { %5465 = vrcp.f32 %v3746_v48 }
 0x83d   : > { %v5464_v25 = vpop.eup %5463 }
 0x83e   : > { %v3889_v50 = vmul.f32 %v5464_v25, %v3816_v21 }
 0x840   : > { %v3890_v39 = vadd.f32 %v3889_v50, %v3886_v1 }
 0x842   : > { %5467 = vtanh.f32 %v3890_v39 }
 0x845   : > { %v5466_v14 = vpop.eup %5465 }
 0x846   : > { %v3892_v6 = vsub.f32 1.0, %v5466_v14  ;;  %v3894_v16 = vmul.f32 %v5466_v14, %v3448_v12 }
 0x84f   : > { %v5468_v29 = vpop.eup %5467 }
 0x850   : > { %v3893_v7 = vmul.f32 %v5468_v29, %v3892_v6 }
 0x852   : > { %v6555_v17 = vadd.f32 %v3894_v16, %v3893_v7 }
 0x854   : > { %5288 = vmatmul.mubr.msk.f32.vlgmr.msra.gmra.mxu1 %vm766_vm9, %v6555_v17 }
 0x855   : > { %5302 = vmatpush3.msra.mxu1 %v6396_v24  ;;  %5309 = vmatprep.mubr.msk.f32.mxu1 %vm5555_vm0, %v5554_v4  ;;  %v4345_v24 = vld [vmem:[%s6666_s14 + $0x10] sm:$0xff] }
 0x856   : > { %5303 = vmatprep.subr.mxu1 %v5554_v4 }
 0x857   : > { %5304 = vmatpush3.msra.mxu1 %v6405_v32  ;;  %v4344_v32 = vld [vmem:[%s6666_s14 + $0x8] sm:$0xff] }
 0x858   : > { %5305 = vmatprep.subr.mxu1 %v5554_v4 }
 0x859   : > { %5306 = vmatpush3.msra.mxu1 %v6412_v26  ;;  %v4343_v26 = vld [vmem:[%s6666_s14] sm:$0xff] }
 0x85a   : > { %5307 = vmatprep.subr.mxu1 %v5554_v4 }
 0x85b   : > { %5308 = vmatpush3.msra.mxu1 %v6419_v31 }
 0x85c   : > { %5310 = vmatmul.mubr.msk.f32.vlgmr.msra.gmra.mxu1 %vm766_vm9, %v6555_v17  ;;  %5323 = vmatprep.subr.mxu1 %v5554_v4 }
 0x85d   : > { %5324 = vmatpush3.msra.mxu1 %v6428_v15  ;;  %5331 = vmatprep.mubr.msk.f32.mxu1 %vm5555_vm0, %v5554_v4 }
 0x85e   : > { %5325 = vmatprep.subr.mxu1 %v5554_v4 }
 0x85f   : > { %5326 = vmatpush3.msra.mxu1 %v6437_v33 }
 0x860   : > { %5327 = vmatprep.subr.mxu1 %v5554_v4 }
 0x861   : > { %5328 = vmatpush3.msra.mxu1 %v6444_v35 }
 0x862   : > { %5329 = vmatprep.subr.mxu1 %v5554_v4 }
 0x863   : > { %5330 = vmatpush3.msra.mxu1 %v6451_v38 }
 0x864   : > { %5332 = vmatmul.mubr.msk.f32.vlgmr.msra.gmra.mxu1 %vm766_vm9, %v6555_v17  ;;  %5345 = vmatprep.subr.mxu1 %v5554_v4 }
 0x865   : > { %5353 = vmatprep.mubr.msk.f32.mxu1 %vm5555_vm0, %v5554_v4  ;;  %5346 = vmatpush3.msra.mxu1 %v4346_v53 }
 0x866   : > { %5347 = vmatprep.subr.mxu1 %v5554_v4 }
 0x867   : > { %5348 = vmatpush3.msra.mxu1 %v4345_v24 }
 0x868   : > { %5349 = vmatprep.subr.mxu1 %v5554_v4 }
 0x869   : > { %5350 = vmatpush3.msra.mxu1 %v4344_v32 }
 0x86a   : > { %5351 = vmatprep.subr.mxu1 %v5554_v4 }
 0x86b   : > { %5352 = vmatpush3.msra.mxu1 %v4343_v26 }
 0x914   : > { %v3965_v31 = vpop.f32.mrf.mxu1 }
 0x915   : > { %v4039_v15 = vadd.f32 %v6290_v57, %v3965_v31 }
 0x916   : > { %v5289_v33 = vpop.f32.mrf.mxu1 }
 0x917   : > { %v4042_v35 = vadd.f32 %v4039_v15, %v6177_v36 }
 0x919   : > { %v4554_v38 = vmul.f32 -1.442695, %v4042_v35 }
 0x91b   : > { %5469 = vpow2.f32 %v4554_v38 }
 0x91c   : > { %v4115_v18 = vpop.f32.mrf.mxu1 }
 0x91d   : > { %v4186_v19 = vadd.f32 %v6292_v60, %v4115_v18  ;;  %v4333_v60 = vadd.f32 %v6294_v62, %v6202_v59 }
 0x91e   : > { %v5311_v22 = vpop.f32.mrf.mxu1 }
 0x91f   : > { %v4189_v0 = vadd.f32 %v4186_v19, %v6184_v42 }
 0x921   : > { %v4557_v20 = vmul.f32 -1.442695, %v4189_v0 }
 0x923   : > { %5471 = vpow2.f32 %v4557_v20 }
 0x924   : > { %v4262_v52 = vpop.f32.mrf.mxu1 }
 0x925   : > { %v4263_v36 = vadd.f32 %v4262_v52, %v6193_v55  ;;  %v4347_v55 = vld [vmem:[%s6667_s15] sm:$0x1] }
 0x926   : > { %v5333_v40 = vpop.f32.mrf.mxu1 }
 0x928   : > { %v5470_v4 = vpop.eup %5469 }
 0x929   : > { %v4046_v43 = vadd.f32 1.0, %v5470_v4 }
 0x92b   : > { %5473 = vrcp.f32 %v4046_v43 }
 0x930   : > { %v5472_v41 = vpop.eup %5471 }
 0x931   : > { %v4193_v57 = vadd.f32 1.0, %v5472_v41 }
 0x933   : > { %5475 = vrcp.f32 %v4193_v57 }
 0x938   : > { %v5474_v45 = vpop.eup %5473 }
 0x939   : > { %v4336_v56 = vmul.f32 %v5474_v45, %v4263_v36 }
 0x93b   : > { %v4337_v42 = vadd.f32 %v4336_v56, %v4333_v60 }
 0x93d   : > { %5477 = vtanh.f32 %v4337_v42 }
 0x940   : > { %v5476_v47 = vpop.eup %5475 }
 0x941   : > { %v4339_v44 = vsub.f32 1.0, %v5476_v47  ;;  %v4341_v8 = vmul.f32 %v5476_v47, %v6555_v17 }
 0x94a   : > { %v5478_v49 = vpop.eup %5477 }
 0x94b   : > { %v4340_v3 = vmul.f32 %v5478_v49, %v4339_v44 }
 0x94d   : > { %v4342_v9 = vadd.f32 %v4341_v8, %v4340_v3 }
 0x94f   : > { %5354 = vmatmul.mubr.msk.f32.vlgmr.msra.gmra.mxu1 %vm766_vm9, %v4342_v9 }
 0xa0f   : > { %v4417_v59 = vpop.f32.mrf.mxu1 }
 0xa10   : > { %v4418_v62 = vadd.f32 %v4417_v59, %v4347_v55 }
 0xa11   : > { %v5355_v10 = vpop.f32.mrf.mxu1 }
 0xa12   : > { %4422 = vst.msk [vmem:[%s513_s1] sm:$0x1] %vm4421_vm10, %v4418_v62 }
 0xa13   : > { %5504 = shalt.err (!%p5501_p3)
}
 0xa14   : > { %s5505_s26 = scalar_lea.hbm %s6617_s3, 16  ;;  %s5509_s28 = scalar_lea.hbm %s6668_s16, 32 }
 0xa15   : > { %p5506_p4 = scmp.ne.s32.totalorder %s6617_s3, %s5505_s26  ;;  %p5510_p9 = scmp.lt.s32.totalorder %s6617_s3, %s6668_s16 }
 0xa16   : > { %p5511_p10 = scmp.lt.s32.totalorder %s5509_s28, %s5505_s26 }
 0xa17   : > { %p5507_p7 = pnand %p5506_p4, %p5680_p5 }
 0xa18   : > { %p5512_p11 = por %p5511_p10, %p5510_p9 }
 0xa19   : > { %p5508_p8 = pneg %p5507_p7 }
 0xa1b   : > { %p5513_p12 = pnand %p5512_p11, %p5508_p8 }
 0xa1d   : > { %5516 = shalt.err (!%p5513_p12)
}
 0xa1e   : > { %5356 = dma.vmem_to_hbm [thread:$0]  (%p5680_p5), %s4437_s2, 16, %s6617_s3, %s4424_s4  }
 0xa1f PF: > { %p5362_p13 = scmp.ge.s32.totalorder %s5551_s24, 2  ;;  %s4448_s5 = sand.u32 1, %s5539_s21  }
 0xa20   : > { %s4449_s19 = scalar_lea.sflag [#allocation3], %s4448_s5 }
 0xa21   : > { %p5359_p0 = pnand %p5362_p13, %p5684_p6 }
 0xa23   : > { %p5360_p1 = pneg %p5359_p0 }
 0xa25   : > { %5534 = dma.done.wait (%p5360_p1), %s4449_s19, 16  }
 0xa26   : > { %5536 = vsyncadd (%p5360_p1), %s4449_s19, 4294967280  ;;  %p26_p2 = scmp.ge.s32.totalorder %s5667_s27, 4   ;;  %s6683_s21 = smov %s5543_s22 }
 0xa27   : > { %s6684_s22 = smov %s5547_s23  ;;  %s6685_s23 = smov %s5678_s30 }
 0xa28   : > { %s6686_s24 = smov %s5667_s27  ;;  %28 = sbr.rel (!%p26_p2) target bundleno = 10 (0xa), region = 119 }
 0xa2d   :  { %4453 = vsyncpa [#allocation3], 1 }
 0xa2e   :  { %4455 = vsyncpa [#allocation3 + $0x1], 1 }

</bundles_post_ra>
